<compile_context>
chip_gen: v7x
topology: tpu7x:2x2x1
jax: 0.10.0
libtpu: 0.0.40
codegen_flags: <defaults>
</compile_context>

<pallas_src>
import functools

import jax
import jax.numpy as jnp
from jax import lax
from jax.experimental import pallas as pl
from jax.experimental.pallas import tpu as pltpu


def _upsample_conv_swish_kernel(x_ref, w_ref, b_ref, o_ref, *, height, width):
    # x_ref: (IMB, C, HW)    original (non-upsampled) activations, HW = H*W lanes
    # w_ref: (4C, C)         stacked folded taps [w0; w1+w2; w0+w1; w2]
    # b_ref: (C, 1)          f32 bias (broadcasts over lanes)
    # o_ref: (IMB, C, 2*HW)  row-interleaved output == NCHW (C, 2H, W) flattened
    imb = x_ref.shape[0]
    c = w_ref.shape[1]
    hw = x_ref.shape[2]

    w4 = w_ref[...]
    bias = b_ref[...].astype(jnp.float32)                   # (C, 1)

    # Boundary masks == the conv's zero padding; hoisted out of the image loop.
    lane = lax.broadcasted_iota(jnp.int32, (c, hw), 1)
    has_prev = lane >= width            # first H-row has no x[h-1]
    has_next = lane < hw - width        # last  H-row has no x[h+1]

    for i in range(imb):                # static unroll over images in this block
        x = x_ref[i]                                          # (C, HW)
        # One MXU call for all four folded taps (bf16 in, f32 accumulate).
        y = jnp.dot(w4, x, preferred_element_type=jnp.float32)   # (4C, HW)
        a_prev = y[0 * c:1 * c]   # w0      @ x[h] -> consumed by row h+1 (x[h-1] tap)
        a_even = y[1 * c:2 * c]   # (w1+w2) @ x[h]
        a_odd  = y[2 * c:3 * c]   # (w0+w1) @ x[h]
        a_next = y[3 * c:4 * c]   # w2      @ x[h] -> consumed by row h-1 (x[h+1] tap)

        # pltpu.roll matches jnp.roll: element l -> l + shift (mod hw).
        prev_h = jnp.where(has_prev, pltpu.roll(a_prev, width, 1), 0.0)
        next_h = jnp.where(has_next, pltpu.roll(a_next, hw - width, 1), 0.0)

        y_even = prev_h + a_even + bias                       # conv rows 2h
        y_odd = a_odd + next_h + bias                         # conv rows 2h+1

        # Swish with an *exact* sigmoid (previous approx reciprocal broke the
        # tolerance check).  exp runs on the EUP; divide is exact.
        z_even = (y_even * (1.0 / (1.0 + jnp.exp(-y_even)))).astype(o_ref.dtype)
        z_odd = (y_odd * (1.0 / (1.0 + jnp.exp(-y_odd)))).astype(o_ref.dtype)

        # Interleave even/odd rows directly into the lane-dense NCHW slab:
        #   output lanes [(2h+p)*W, (2h+p+1)*W)  <-  row-h slice of parity p.
        # Static W-lane slices / masked stores; all VMEM-resident, overlaps DMA.
        for h in range(height):
            lo = h * width
            src_e = z_even[:, lo:lo + width]
            src_o = z_odd[:, lo:lo + width]
            o_ref[i, :, (2 * h) * width:(2 * h + 1) * width] = src_e
            o_ref[i, :, (2 * h + 1) * width:(2 * h + 2) * width] = src_o


def upsample_noise_level(x, weight, bias, *, images_per_step=1,
                         compute_dtype=jnp.bfloat16):
    """x: (B, C, H, W) NCHW; weight: (C, C, 3, 1); bias: (C,). Returns (B, C, 2H, W).

    compute_dtype: dtype of the MXU operands (bf16 default per perf review;
    accumulation / epilogue always f32).  images_per_step packs that many images
    into one grid step to amortize per-step pipeline overhead on small images.
    """
    B, C, H, W = x.shape
    HW = H * W
    imb = int(images_per_step)
    if imb < 1 or B % imb != 0:
        raise ValueError(f"images_per_step={imb} must divide batch {B}")

    # Fold the nearest 2x upsample into the conv weights (see module header).
    w0 = weight[:, :, 0, 0]
    w1 = weight[:, :, 1, 0]
    w2 = weight[:, :, 2, 0]
    w4 = jnp.concatenate([w0, w1 + w2, w0 + w1, w2], axis=0).astype(compute_dtype)
    b2 = bias.reshape(C, 1).astype(jnp.float32)
    x2 = x.reshape(B, C, HW).astype(compute_dtype)           # lane-dense input

    kernel = functools.partial(_upsample_conv_swish_kernel, height=H, width=W)
    out = pl.pallas_call(
        kernel,
        out_shape=jax.ShapeDtypeStruct((B, C, 2 * HW), x.dtype),
        grid_spec=pltpu.PrefetchScalarGridSpec(
            num_scalar_prefetch=0,
            grid=(B // imb,),
            in_specs=[
                pl.BlockSpec((imb, C, HW), lambda g: (g, 0, 0)),
                pl.BlockSpec((4 * C, C), lambda g: (0, 0)),   # resident weights
                pl.BlockSpec((C, 1), lambda g: (0, 0)),       # resident bias
            ],
            out_specs=pl.BlockSpec((imb, C, 2 * HW), lambda g: (g, 0, 0)),
        ),
        compiler_params=pltpu.CompilerParams(
            dimension_semantics=("parallel",),
            # Blocks here are tiny; 32 MiB is safe on v5e/v6e and on v7x's 64 MiB.
            vmem_limit_bytes=32 * 1024 * 1024,
        ),
    )(x2, w4, b2)

    # (B, C, 2*H*W) -> (B, C, 2H, W): rows are already interleaved in-kernel,
    # so this reshape is free (no transpose, no extra HBM pass).
    return out.reshape(B, C, 2 * H, W)


def _reference(x, weight, bias):
    """Pure-JAX f32 reference mirroring the PyTorch module."""
    up = jnp.repeat(x, 2, axis=2)
    y = jax.lax.conv_general_dilated(
        up, weight, window_strides=(1, 1),
        padding=((1, 1), (0, 0)),
        dimension_numbers=("NCHW", "OIHW", "NCHW"))
    y = y + bias.reshape(1, -1, 1, 1)
    return y * jax.nn.sigmoid(y)


if __name__ == "__main__":
    B, dim, H, W = 2, 32, 16, 8

    key = jax.random.PRNGKey(0)
    kx, kw, kb = jax.random.split(key, 3)

    x = jax.random.normal(kx, (B, dim, H, W), dtype=jnp.float32)
    # Deterministic PyTorch-style init: uniform with bound 1/sqrt(fan_in).
    fan_in = dim * 3 * 1
    bound = 1.0 / (fan_in ** 0.5)
    weight = jax.random.uniform(kw, (dim, dim, 3, 1), jnp.float32, -bound, bound)
    bias = jax.random.uniform(kb, (dim,), jnp.float32, -bound, bound)

    ref = _reference(x, weight, bias)

    # Default config: bf16 MXU operands, one image per (parallel) grid step.
    fn1 = jax.jit(functools.partial(upsample_noise_level, images_per_step=1))
    out1 = jax.block_until_ready(fn1(x, weight, bias))
    assert out1.shape == (B, dim, 2 * H, W)
    # Tolerance accounts for bf16 MXU operands (rel ~4e-3 per element, values
    # O(1)); the Swish itself is exact.  Measured error is ~1e-2 or below.
    assert jnp.allclose(out1, ref, atol=5e-2, rtol=5e-2), float(
        jnp.max(jnp.abs(out1 - ref)))

    # Also exercise the multi-image-per-step path (amortizes per-step overhead).
    fn2 = jax.jit(functools.partial(upsample_noise_level, images_per_step=2))
    out2 = jax.block_until_ready(fn2(x, weight, bias))
    assert jnp.allclose(out2, ref, atol=5e-2, rtol=5e-2), float(
        jnp.max(jnp.abs(out2 - ref)))
    # Both configs run the identical per-image math.
    assert jnp.allclose(out1, out2, atol=1e-5, rtol=1e-5)

    print("KERNEL_OK")
</pallas_src>

<mosaic_0001>
module attributes {stable_mosaic.version = 11 : i64} {
  func.func @_upsample_conv_swish_kernel(%arg0: i32, %arg1: memref<1x32x128xbf16, #tpu.memory_space<vmem>>, %arg2: memref<128x32xbf16, #tpu.memory_space<vmem>>, %arg3: memref<32x1xf32, #tpu.memory_space<vmem>>, %arg4: memref<1x32x256xf32, #tpu.memory_space<vmem>>) attributes {dimension_semantics = [#tpu.dimension_semantics<parallel>], iteration_bounds = array<i64: 2>, scalar_prefetch = 0 : i64, scratch_operands = 0 : i64, tpu.core_type = #tpu.core_type<tc>, window_params = [{transform_indices = @transform_0, window_bounds = array<i64: 1, 32, 128>}, {pipeline_mode = #tpu.pipeline_mode<synchronous>, transform_indices = @transform_1, window_bounds = array<i64: 128, 32>}, {pipeline_mode = #tpu.pipeline_mode<synchronous>, transform_indices = @transform_2, window_bounds = array<i64: 32, 1>}, {transform_indices = @transform_3, window_bounds = array<i64: 1, 32, 256>}]} {
    %c0 = arith.constant 0 : index
    %c0_0 = arith.constant 0 : index
    %0 = vector.load %arg2[%c0, %c0_0] : memref<128x32xbf16, #tpu.memory_space<vmem>>, vector<128x32xbf16>
    %c0_1 = arith.constant 0 : index
    %c0_2 = arith.constant 0 : index
    %1 = vector.load %arg3[%c0_1, %c0_2] : memref<32x1xf32, #tpu.memory_space<vmem>>, vector<32x1xf32>
    %2 = tpu.iota {dimensions = array<i32: 1>} : vector<32x128xi32>
    %c8_i32 = arith.constant 8 : i32
    %3 = vector.broadcast %c8_i32 : i32 to vector<32x128xi32>
    %4 = arith.cmpi sge, %2, %3 : vector<32x128xi32>
    %c120_i32 = arith.constant 120 : i32
    %5 = vector.broadcast %c120_i32 : i32 to vector<32x128xi32>
    %6 = arith.cmpi slt, %2, %5 : vector<32x128xi32>
    %c0_3 = arith.constant 0 : index
    %c0_4 = arith.constant 0 : index
    %c0_5 = arith.constant 0 : index
    %7 = vector.load %arg1[%c0_3, %c0_4, %c0_5] : memref<1x32x128xbf16, #tpu.memory_space<vmem>>, vector<1x32x128xbf16>
    %8 = vector.shape_cast %7 : vector<1x32x128xbf16> to vector<32x128xbf16>
    %cst = arith.constant dense<0.000000e+00> : vector<128x128xf32>
    %9 = tpu.matmul %0, %8, %cst {dimension_numbers = #tpu.dot_dimension_numbers<[1], [0], [0], [1], [0, 0, 1, 1], [], []>} : vector<128x32xbf16>, vector<32x128xbf16>, vector<128x128xf32> -> vector<128x128xf32>
    %10 = vector.extract_strided_slice %9 {offsets = [0, 0], sizes = [32, 128], strides = [1, 1]} : vector<128x128xf32> to vector<32x128xf32>
    %11 = vector.extract_strided_slice %9 {offsets = [32, 0], sizes = [32, 128], strides = [1, 1]} : vector<128x128xf32> to vector<32x128xf32>
    %12 = vector.extract_strided_slice %9 {offsets = [64, 0], sizes = [32, 128], strides = [1, 1]} : vector<128x128xf32> to vector<32x128xf32>
    %13 = vector.extract_strided_slice %9 {offsets = [96, 0], sizes = [32, 128], strides = [1, 1]} : vector<128x128xf32> to vector<32x128xf32>
    %c8_i32_6 = arith.constant 8 : i32
    %14 = tpu.dynamic_rotate %10 by %c8_i32_6 dim 1 : vector<32x128xf32>, i32 -> vector<32x128xf32>
    %cst_7 = arith.constant 0.000000e+00 : f32
    %15 = vector.broadcast %cst_7 : f32 to vector<32x128xf32>
    %16 = arith.select %4, %14, %15 : vector<32x128xi1>, vector<32x128xf32>
    %c120_i32_8 = arith.constant 120 : i32
    %17 = tpu.dynamic_rotate %13 by %c120_i32_8 dim 1 : vector<32x128xf32>, i32 -> vector<32x128xf32>
    %cst_9 = arith.constant 0.000000e+00 : f32
    %18 = vector.broadcast %cst_9 : f32 to vector<32x128xf32>
    %19 = arith.select %6, %17, %18 : vector<32x128xi1>, vector<32x128xf32>
    %20 = arith.addf %16, %11 : vector<32x128xf32>
    %21 = vector.broadcast %1 : vector<32x1xf32> to vector<32x128xf32>
    %22 = arith.addf %20, %21 : vector<32x128xf32>
    %23 = arith.addf %12, %19 : vector<32x128xf32>
    %24 = vector.broadcast %1 : vector<32x1xf32> to vector<32x128xf32>
    %25 = arith.addf %23, %24 : vector<32x128xf32>
    %cst_10 = arith.constant 0.000000e+00 : f32
    %26 = vector.broadcast %cst_10 : f32 to vector<32x128xf32>
    %27 = arith.subf %26, %22 : vector<32x128xf32>
    %28 = math.exp %27 : vector<32x128xf32>
    %cst_11 = arith.constant 1.000000e+00 : f32
    %29 = vector.broadcast %cst_11 : f32 to vector<32x128xf32>
    %30 = arith.addf %29, %28 : vector<32x128xf32>
    %cst_12 = arith.constant 1.000000e+00 : f32
    %31 = vector.broadcast %cst_12 : f32 to vector<32x128xf32>
    %32 = arith.divf %31, %30 : vector<32x128xf32>
    %33 = arith.mulf %22, %32 : vector<32x128xf32>
    %cst_13 = arith.constant 0.000000e+00 : f32
    %34 = vector.broadcast %cst_13 : f32 to vector<32x128xf32>
    %35 = arith.subf %34, %25 : vector<32x128xf32>
    %36 = math.exp %35 : vector<32x128xf32>
    %cst_14 = arith.constant 1.000000e+00 : f32
    %37 = vector.broadcast %cst_14 : f32 to vector<32x128xf32>
    %38 = arith.addf %37, %36 : vector<32x128xf32>
    %cst_15 = arith.constant 1.000000e+00 : f32
    %39 = vector.broadcast %cst_15 : f32 to vector<32x128xf32>
    %40 = arith.divf %39, %38 : vector<32x128xf32>
    %41 = arith.mulf %25, %40 : vector<32x128xf32>
    %42 = vector.extract_strided_slice %33 {offsets = [0, 0], sizes = [32, 8], strides = [1, 1]} : vector<32x128xf32> to vector<32x8xf32>
    %43 = vector.extract_strided_slice %41 {offsets = [0, 0], sizes = [32, 8], strides = [1, 1]} : vector<32x128xf32> to vector<32x8xf32>
    %c0_16 = arith.constant 0 : index
    %c0_17 = arith.constant 0 : index
    %c0_18 = arith.constant 0 : index
    %44 = vector.load %arg4[%c0_16, %c0_17, %c0_18] : memref<1x32x256xf32, #tpu.memory_space<vmem>>, vector<1x32x8xf32>
    %45 = vector.shape_cast %44 : vector<1x32x8xf32> to vector<32x8xf32>
    %46 = vector.shape_cast %42 : vector<32x8xf32> to vector<1x32x8xf32>
    tpu.vector_store %arg4[%c0_16, %c0_17, %c0_18], %46 {strides = array<i32>} : memref<1x32x256xf32, #tpu.memory_space<vmem>>, vector<1x32x8xf32>,
    %c0_19 = arith.constant 0 : index
    %c0_20 = arith.constant 0 : index
    %c8 = arith.constant 8 : index
    %47 = vector.load %arg4[%c0_19, %c0_20, %c8] : memref<1x32x256xf32, #tpu.memory_space<vmem>>, vector<1x32x8xf32>
    %48 = vector.shape_cast %47 : vector<1x32x8xf32> to vector<32x8xf32>
    %49 = vector.shape_cast %43 : vector<32x8xf32> to vector<1x32x8xf32>
    tpu.vector_store %arg4[%c0_19, %c0_20, %c8], %49 {strides = array<i32>} : memref<1x32x256xf32, #tpu.memory_space<vmem>>, vector<1x32x8xf32>,
    %50 = vector.extract_strided_slice %33 {offsets = [0, 8], sizes = [32, 8], strides = [1, 1]} : vector<32x128xf32> to vector<32x8xf32>
    %51 = vector.extract_strided_slice %41 {offsets = [0, 8], sizes = [32, 8], strides = [1, 1]} : vector<32x128xf32> to vector<32x8xf32>
    %c0_21 = arith.constant 0 : index
    %c0_22 = arith.constant 0 : index
    %c16 = arith.constant 16 : index
    %52 = vector.load %arg4[%c0_21, %c0_22, %c16] : memref<1x32x256xf32, #tpu.memory_space<vmem>>, vector<1x32x8xf32>
    %53 = vector.shape_cast %52 : vector<1x32x8xf32> to vector<32x8xf32>
    %54 = vector.shape_cast %50 : vector<32x8xf32> to vector<1x32x8xf32>
    tpu.vector_store %arg4[%c0_21, %c0_22, %c16], %54 {strides = array<i32>} : memref<1x32x256xf32, #tpu.memory_space<vmem>>, vector<1x32x8xf32>,
    %c0_23 = arith.constant 0 : index
    %c0_24 = arith.constant 0 : index
    %c24 = arith.constant 24 : index
    %55 = vector.load %arg4[%c0_23, %c0_24, %c24] : memref<1x32x256xf32, #tpu.memory_space<vmem>>, vector<1x32x8xf32>
    %56 = vector.shape_cast %55 : vector<1x32x8xf32> to vector<32x8xf32>
    %57 = vector.shape_cast %51 : vector<32x8xf32> to vector<1x32x8xf32>
    tpu.vector_store %arg4[%c0_23, %c0_24, %c24], %57 {strides = array<i32>} : memref<1x32x256xf32, #tpu.memory_space<vmem>>, vector<1x32x8xf32>,
    %58 = vector.extract_strided_slice %33 {offsets = [0, 16], sizes = [32, 8], strides = [1, 1]} : vector<32x128xf32> to vector<32x8xf32>
    %59 = vector.extract_strided_slice %41 {offsets = [0, 16], sizes = [32, 8], strides = [1, 1]} : vector<32x128xf32> to vector<32x8xf32>
    %c0_25 = arith.constant 0 : index
    %c0_26 = arith.constant 0 : index
    %c32 = arith.constant 32 : index
    %60 = vector.load %arg4[%c0_25, %c0_26, %c32] : memref<1x32x256xf32, #tpu.memory_space<vmem>>, vector<1x32x8xf32>
    %61 = vector.shape_cast %60 : vector<1x32x8xf32> to vector<32x8xf32>
    %62 = vector.shape_cast %58 : vector<32x8xf32> to vector<1x32x8xf32>
    tpu.vector_store %arg4[%c0_25, %c0_26, %c32], %62 {strides = array<i32>} : memref<1x32x256xf32, #tpu.memory_space<vmem>>, vector<1x32x8xf32>,
    %c0_27 = arith.constant 0 : index
    %c0_28 = arith.constant 0 : index
    %c40 = arith.constant 40 : index
    %63 = vector.load %arg4[%c0_27, %c0_28, %c40] : memref<1x32x256xf32, #tpu.memory_space<vmem>>, vector<1x32x8xf32>
    %64 = vector.shape_cast %63 : vector<1x32x8xf32> to vector<32x8xf32>
    %65 = vector.shape_cast %59 : vector<32x8xf32> to vector<1x32x8xf32>
    tpu.vector_store %arg4[%c0_27, %c0_28, %c40], %65 {strides = array<i32>} : memref<1x32x256xf32, #tpu.memory_space<vmem>>, vector<1x32x8xf32>,
    %66 = vector.extract_strided_slice %33 {offsets = [0, 24], sizes = [32, 8], strides = [1, 1]} : vector<32x128xf32> to vector<32x8xf32>
    %67 = vector.extract_strided_slice %41 {offsets = [0, 24], sizes = [32, 8], strides = [1, 1]} : vector<32x128xf32> to vector<32x8xf32>
    %c0_29 = arith.constant 0 : index
    %c0_30 = arith.constant 0 : index
    %c48 = arith.constant 48 : index
    %68 = vector.load %arg4[%c0_29, %c0_30, %c48] : memref<1x32x256xf32, #tpu.memory_space<vmem>>, vector<1x32x8xf32>
    %69 = vector.shape_cast %68 : vector<1x32x8xf32> to vector<32x8xf32>
    %70 = vector.shape_cast %66 : vector<32x8xf32> to vector<1x32x8xf32>
    tpu.vector_store %arg4[%c0_29, %c0_30, %c48], %70 {strides = array<i32>} : memref<1x32x256xf32, #tpu.memory_space<vmem>>, vector<1x32x8xf32>,
    %c0_31 = arith.constant 0 : index
    %c0_32 = arith.constant 0 : index
    %c56 = arith.constant 56 : index
    %71 = vector.load %arg4[%c0_31, %c0_32, %c56] : memref<1x32x256xf32, #tpu.memory_space<vmem>>, vector<1x32x8xf32>
    %72 = vector.shape_cast %71 : vector<1x32x8xf32> to vector<32x8xf32>
    %73 = vector.shape_cast %67 : vector<32x8xf32> to vector<1x32x8xf32>
    tpu.vector_store %arg4[%c0_31, %c0_32, %c56], %73 {strides = array<i32>} : memref<1x32x256xf32, #tpu.memory_space<vmem>>, vector<1x32x8xf32>,
    %74 = vector.extract_strided_slice %33 {offsets = [0, 32], sizes = [32, 8], strides = [1, 1]} : vector<32x128xf32> to vector<32x8xf32>
    %75 = vector.extract_strided_slice %41 {offsets = [0, 32], sizes = [32, 8], strides = [1, 1]} : vector<32x128xf32> to vector<32x8xf32>
    %c0_33 = arith.constant 0 : index
    %c0_34 = arith.constant 0 : index
    %c64 = arith.constant 64 : index
    %76 = vector.load %arg4[%c0_33, %c0_34, %c64] : memref<1x32x256xf32, #tpu.memory_space<vmem>>, vector<1x32x8xf32>
    %77 = vector.shape_cast %76 : vector<1x32x8xf32> to vector<32x8xf32>
    %78 = vector.shape_cast %74 : vector<32x8xf32> to vector<1x32x8xf32>
    tpu.vector_store %arg4[%c0_33, %c0_34, %c64], %78 {strides = array<i32>} : memref<1x32x256xf32, #tpu.memory_space<vmem>>, vector<1x32x8xf32>,
    %c0_35 = arith.constant 0 : index
    %c0_36 = arith.constant 0 : index
    %c72 = arith.constant 72 : index
    %79 = vector.load %arg4[%c0_35, %c0_36, %c72] : memref<1x32x256xf32, #tpu.memory_space<vmem>>, vector<1x32x8xf32>
    %80 = vector.shape_cast %79 : vector<1x32x8xf32> to vector<32x8xf32>
    %81 = vector.shape_cast %75 : vector<32x8xf32> to vector<1x32x8xf32>
    tpu.vector_store %arg4[%c0_35, %c0_36, %c72], %81 {strides = array<i32>} : memref<1x32x256xf32, #tpu.memory_space<vmem>>, vector<1x32x8xf32>,
    %82 = vector.extract_strided_slice %33 {offsets = [0, 40], sizes = [32, 8], strides = [1, 1]} : vector<32x128xf32> to vector<32x8xf32>
    %83 = vector.extract_strided_slice %41 {offsets = [0, 40], sizes = [32, 8], strides = [1, 1]} : vector<32x128xf32> to vector<32x8xf32>
    %c0_37 = arith.constant 0 : index
    %c0_38 = arith.constant 0 : index
    %c80 = arith.constant 80 : index
    %84 = vector.load %arg4[%c0_37, %c0_38, %c80] : memref<1x32x256xf32, #tpu.memory_space<vmem>>, vector<1x32x8xf32>
    %85 = vector.shape_cast %84 : vector<1x32x8xf32> to vector<32x8xf32>
    %86 = vector.shape_cast %82 : vector<32x8xf32> to vector<1x32x8xf32>
    tpu.vector_store %arg4[%c0_37, %c0_38, %c80], %86 {strides = array<i32>} : memref<1x32x256xf32, #tpu.memory_space<vmem>>, vector<1x32x8xf32>,
    %c0_39 = arith.constant 0 : index
    %c0_40 = arith.constant 0 : index
    %c88 = arith.constant 88 : index
    %87 = vector.load %arg4[%c0_39, %c0_40, %c88] : memref<1x32x256xf32, #tpu.memory_space<vmem>>, vector<1x32x8xf32>
    %88 = vector.shape_cast %87 : vector<1x32x8xf32> to vector<32x8xf32>
    %89 = vector.shape_cast %83 : vector<32x8xf32> to vector<1x32x8xf32>
    tpu.vector_store %arg4[%c0_39, %c0_40, %c88], %89 {strides = array<i32>} : memref<1x32x256xf32, #tpu.memory_space<vmem>>, vector<1x32x8xf32>,
    %90 = vector.extract_strided_slice %33 {offsets = [0, 48], sizes = [32, 8], strides = [1, 1]} : vector<32x128xf32> to vector<32x8xf32>
    %91 = vector.extract_strided_slice %41 {offsets = [0, 48], sizes = [32, 8], strides = [1, 1]} : vector<32x128xf32> to vector<32x8xf32>
    %c0_41 = arith.constant 0 : index
    %c0_42 = arith.constant 0 : index
    %c96 = arith.constant 96 : index
    %92 = vector.load %arg4[%c0_41, %c0_42, %c96] : memref<1x32x256xf32, #tpu.memory_space<vmem>>, vector<1x32x8xf32>
    %93 = vector.shape_cast %92 : vector<1x32x8xf32> to vector<32x8xf32>
    %94 = vector.shape_cast %90 : vector<32x8xf32> to vector<1x32x8xf32>
    tpu.vector_store %arg4[%c0_41, %c0_42, %c96], %94 {strides = array<i32>} : memref<1x32x256xf32, #tpu.memory_space<vmem>>, vector<1x32x8xf32>,
    %c0_43 = arith.constant 0 : index
    %c0_44 = arith.constant 0 : index
    %c104 = arith.constant 104 : index
    %95 = vector.load %arg4[%c0_43, %c0_44, %c104] : memref<1x32x256xf32, #tpu.memory_space<vmem>>, vector<1x32x8xf32>
    %96 = vector.shape_cast %95 : vector<1x32x8xf32> to vector<32x8xf32>
    %97 = vector.shape_cast %91 : vector<32x8xf32> to vector<1x32x8xf32>
    tpu.vector_store %arg4[%c0_43, %c0_44, %c104], %97 {strides = array<i32>} : memref<1x32x256xf32, #tpu.memory_space<vmem>>, vector<1x32x8xf32>,
    %98 = vector.extract_strided_slice %33 {offsets = [0, 56], sizes = [32, 8], strides = [1, 1]} : vector<32x128xf32> to vector<32x8xf32>
    %99 = vector.extract_strided_slice %41 {offsets = [0, 56], sizes = [32, 8], strides = [1, 1]} : vector<32x128xf32> to vector<32x8xf32>
    %c0_45 = arith.constant 0 : index
    %c0_46 = arith.constant 0 : index
    %c112 = arith.constant 112 : index
    %100 = vector.load %arg4[%c0_45, %c0_46, %c112] : memref<1x32x256xf32, #tpu.memory_space<vmem>>, vector<1x32x8xf32>
    %101 = vector.shape_cast %100 : vector<1x32x8xf32> to vector<32x8xf32>
    %102 = vector.shape_cast %98 : vector<32x8xf32> to vector<1x32x8xf32>
    tpu.vector_store %arg4[%c0_45, %c0_46, %c112], %102 {strides = array<i32>} : memref<1x32x256xf32, #tpu.memory_space<vmem>>, vector<1x32x8xf32>,
    %c0_47 = arith.constant 0 : index
    %c0_48 = arith.constant 0 : index
    %c120 = arith.constant 120 : index
    %103 = vector.load %arg4[%c0_47, %c0_48, %c120] : memref<1x32x256xf32, #tpu.memory_space<vmem>>, vector<1x32x8xf32>
    %104 = vector.shape_cast %103 : vector<1x32x8xf32> to vector<32x8xf32>
    %105 = vector.shape_cast %99 : vector<32x8xf32> to vector<1x32x8xf32>
    tpu.vector_store %arg4[%c0_47, %c0_48, %c120], %105 {strides = array<i32>} : memref<1x32x256xf32, #tpu.memory_space<vmem>>, vector<1x32x8xf32>,
    %106 = vector.extract_strided_slice %33 {offsets = [0, 64], sizes = [32, 8], strides = [1, 1]} : vector<32x128xf32> to vector<32x8xf32>
    %107 = vector.extract_strided_slice %41 {offsets = [0, 64], sizes = [32, 8], strides = [1, 1]} : vector<32x128xf32> to vector<32x8xf32>
    %c0_49 = arith.constant 0 : index
    %c0_50 = arith.constant 0 : index
    %c128 = arith.constant 128 : index
    %108 = vector.load %arg4[%c0_49, %c0_50, %c128] : memref<1x32x256xf32, #tpu.memory_space<vmem>>, vector<1x32x8xf32>
    %109 = vector.shape_cast %108 : vector<1x32x8xf32> to vector<32x8xf32>
    %110 = vector.shape_cast %106 : vector<32x8xf32> to vector<1x32x8xf32>
    tpu.vector_store %arg4[%c0_49, %c0_50, %c128], %110 {strides = array<i32>} : memref<1x32x256xf32, #tpu.memory_space<vmem>>, vector<1x32x8xf32>,
    %c0_51 = arith.constant 0 : index
    %c0_52 = arith.constant 0 : index
    %c136 = arith.constant 136 : index
    %111 = vector.load %arg4[%c0_51, %c0_52, %c136] : memref<1x32x256xf32, #tpu.memory_space<vmem>>, vector<1x32x8xf32>
    %112 = vector.shape_cast %111 : vector<1x32x8xf32> to vector<32x8xf32>
    %113 = vector.shape_cast %107 : vector<32x8xf32> to vector<1x32x8xf32>
    tpu.vector_store %arg4[%c0_51, %c0_52, %c136], %113 {strides = array<i32>} : memref<1x32x256xf32, #tpu.memory_space<vmem>>, vector<1x32x8xf32>,
    %114 = vector.extract_strided_slice %33 {offsets = [0, 72], sizes = [32, 8], strides = [1, 1]} : vector<32x128xf32> to vector<32x8xf32>
    %115 = vector.extract_strided_slice %41 {offsets = [0, 72], sizes = [32, 8], strides = [1, 1]} : vector<32x128xf32> to vector<32x8xf32>
    %c0_53 = arith.constant 0 : index
    %c0_54 = arith.constant 0 : index
    %c144 = arith.constant 144 : index
    %116 = vector.load %arg4[%c0_53, %c0_54, %c144] : memref<1x32x256xf32, #tpu.memory_space<vmem>>, vector<1x32x8xf32>
    %117 = vector.shape_cast %116 : vector<1x32x8xf32> to vector<32x8xf32>
    %118 = vector.shape_cast %114 : vector<32x8xf32> to vector<1x32x8xf32>
    tpu.vector_store %arg4[%c0_53, %c0_54, %c144], %118 {strides = array<i32>} : memref<1x32x256xf32, #tpu.memory_space<vmem>>, vector<1x32x8xf32>,
    %c0_55 = arith.constant 0 : index
    %c0_56 = arith.constant 0 : index
    %c152 = arith.constant 152 : index
    %119 = vector.load %arg4[%c0_55, %c0_56, %c152] : memref<1x32x256xf32, #tpu.memory_space<vmem>>, vector<1x32x8xf32>
    %120 = vector.shape_cast %119 : vector<1x32x8xf32> to vector<32x8xf32>
    %121 = vector.shape_cast %115 : vector<32x8xf32> to vector<1x32x8xf32>
    tpu.vector_store %arg4[%c0_55, %c0_56, %c152], %121 {strides = array<i32>} : memref<1x32x256xf32, #tpu.memory_space<vmem>>, vector<1x32x8xf32>,
    %122 = vector.extract_strided_slice %33 {offsets = [0, 80], sizes = [32, 8], strides = [1, 1]} : vector<32x128xf32> to vector<32x8xf32>
    %123 = vector.extract_strided_slice %41 {offsets = [0, 80], sizes = [32, 8], strides = [1, 1]} : vector<32x128xf32> to vector<32x8xf32>
    %c0_57 = arith.constant 0 : index
    %c0_58 = arith.constant 0 : index
    %c160 = arith.constant 160 : index
    %124 = vector.load %arg4[%c0_57, %c0_58, %c160] : memref<1x32x256xf32, #tpu.memory_space<vmem>>, vector<1x32x8xf32>
    %125 = vector.shape_cast %124 : vector<1x32x8xf32> to vector<32x8xf32>
    %126 = vector.shape_cast %122 : vector<32x8xf32> to vector<1x32x8xf32>
    tpu.vector_store %arg4[%c0_57, %c0_58, %c160], %126 {strides = array<i32>} : memref<1x32x256xf32, #tpu.memory_space<vmem>>, vector<1x32x8xf32>,
    %c0_59 = arith.constant 0 : index
    %c0_60 = arith.constant 0 : index
    %c168 = arith.constant 168 : index
    %127 = vector.load %arg4[%c0_59, %c0_60, %c168] : memref<1x32x256xf32, #tpu.memory_space<vmem>>, vector<1x32x8xf32>
    %128 = vector.shape_cast %127 : vector<1x32x8xf32> to vector<32x8xf32>
    %129 = vector.shape_cast %123 : vector<32x8xf32> to vector<1x32x8xf32>
    tpu.vector_store %arg4[%c0_59, %c0_60, %c168], %129 {strides = array<i32>} : memref<1x32x256xf32, #tpu.memory_space<vmem>>, vector<1x32x8xf32>,
    %130 = vector.extract_strided_slice %33 {offsets = [0, 88], sizes = [32, 8], strides = [1, 1]} : vector<32x128xf32> to vector<32x8xf32>
    %131 = vector.extract_strided_slice %41 {offsets = [0, 88], sizes = [32, 8], strides = [1, 1]} : vector<32x128xf32> to vector<32x8xf32>
    %c0_61 = arith.constant 0 : index
    %c0_62 = arith.constant 0 : index
    %c176 = arith.constant 176 : index
    %132 = vector.load %arg4[%c0_61, %c0_62, %c176] : memref<1x32x256xf32, #tpu.memory_space<vmem>>, vector<1x32x8xf32>
    %133 = vector.shape_cast %132 : vector<1x32x8xf32> to vector<32x8xf32>
    %134 = vector.shape_cast %130 : vector<32x8xf32> to vector<1x32x8xf32>
    tpu.vector_store %arg4[%c0_61, %c0_62, %c176], %134 {strides = array<i32>} : memref<1x32x256xf32, #tpu.memory_space<vmem>>, vector<1x32x8xf32>,
    %c0_63 = arith.constant 0 : index
    %c0_64 = arith.constant 0 : index
    %c184 = arith.constant 184 : index
    %135 = vector.load %arg4[%c0_63, %c0_64, %c184] : memref<1x32x256xf32, #tpu.memory_space<vmem>>, vector<1x32x8xf32>
    %136 = vector.shape_cast %135 : vector<1x32x8xf32> to vector<32x8xf32>
    %137 = vector.shape_cast %131 : vector<32x8xf32> to vector<1x32x8xf32>
    tpu.vector_store %arg4[%c0_63, %c0_64, %c184], %137 {strides = array<i32>} : memref<1x32x256xf32, #tpu.memory_space<vmem>>, vector<1x32x8xf32>,
    %138 = vector.extract_strided_slice %33 {offsets = [0, 96], sizes = [32, 8], strides = [1, 1]} : vector<32x128xf32> to vector<32x8xf32>
    %139 = vector.extract_strided_slice %41 {offsets = [0, 96], sizes = [32, 8], strides = [1, 1]} : vector<32x128xf32> to vector<32x8xf32>
    %c0_65 = arith.constant 0 : index
    %c0_66 = arith.constant 0 : index
    %c192 = arith.constant 192 : index
    %140 = vector.load %arg4[%c0_65, %c0_66, %c192] : memref<1x32x256xf32, #tpu.memory_space<vmem>>, vector<1x32x8xf32>
    %141 = vector.shape_cast %140 : vector<1x32x8xf32> to vector<32x8xf32>
    %142 = vector.shape_cast %138 : vector<32x8xf32> to vector<1x32x8xf32>
    tpu.vector_store %arg4[%c0_65, %c0_66, %c192], %142 {strides = array<i32>} : memref<1x32x256xf32, #tpu.memory_space<vmem>>, vector<1x32x8xf32>,
    %c0_67 = arith.constant 0 : index
    %c0_68 = arith.constant 0 : index
    %c200 = arith.constant 200 : index
    %143 = vector.load %arg4[%c0_67, %c0_68, %c200] : memref<1x32x256xf32, #tpu.memory_space<vmem>>, vector<1x32x8xf32>
    %144 = vector.shape_cast %143 : vector<1x32x8xf32> to vector<32x8xf32>
    %145 = vector.shape_cast %139 : vector<32x8xf32> to vector<1x32x8xf32>
    tpu.vector_store %arg4[%c0_67, %c0_68, %c200], %145 {strides = array<i32>} : memref<1x32x256xf32, #tpu.memory_space<vmem>>, vector<1x32x8xf32>,
    %146 = vector.extract_strided_slice %33 {offsets = [0, 104], sizes = [32, 8], strides = [1, 1]} : vector<32x128xf32> to vector<32x8xf32>
    %147 = vector.extract_strided_slice %41 {offsets = [0, 104], sizes = [32, 8], strides = [1, 1]} : vector<32x128xf32> to vector<32x8xf32>
    %c0_69 = arith.constant 0 : index
    %c0_70 = arith.constant 0 : index
    %c208 = arith.constant 208 : index
    %148 = vector.load %arg4[%c0_69, %c0_70, %c208] : memref<1x32x256xf32, #tpu.memory_space<vmem>>, vector<1x32x8xf32>
    %149 = vector.shape_cast %148 : vector<1x32x8xf32> to vector<32x8xf32>
    %150 = vector.shape_cast %146 : vector<32x8xf32> to vector<1x32x8xf32>
    tpu.vector_store %arg4[%c0_69, %c0_70, %c208], %150 {strides = array<i32>} : memref<1x32x256xf32, #tpu.memory_space<vmem>>, vector<1x32x8xf32>,
    %c0_71 = arith.constant 0 : index
    %c0_72 = arith.constant 0 : index
    %c216 = arith.constant 216 : index
    %151 = vector.load %arg4[%c0_71, %c0_72, %c216] : memref<1x32x256xf32, #tpu.memory_space<vmem>>, vector<1x32x8xf32>
    %152 = vector.shape_cast %151 : vector<1x32x8xf32> to vector<32x8xf32>
    %153 = vector.shape_cast %147 : vector<32x8xf32> to vector<1x32x8xf32>
    tpu.vector_store %arg4[%c0_71, %c0_72, %c216], %153 {strides = array<i32>} : memref<1x32x256xf32, #tpu.memory_space<vmem>>, vector<1x32x8xf32>,
    %154 = vector.extract_strided_slice %33 {offsets = [0, 112], sizes = [32, 8], strides = [1, 1]} : vector<32x128xf32> to vector<32x8xf32>
    %155 = vector.extract_strided_slice %41 {offsets = [0, 112], sizes = [32, 8], strides = [1, 1]} : vector<32x128xf32> to vector<32x8xf32>
    %c0_73 = arith.constant 0 : index
    %c0_74 = arith.constant 0 : index
    %c224 = arith.constant 224 : index
    %156 = vector.load %arg4[%c0_73, %c0_74, %c224] : memref<1x32x256xf32, #tpu.memory_space<vmem>>, vector<1x32x8xf32>
    %157 = vector.shape_cast %156 : vector<1x32x8xf32> to vector<32x8xf32>
    %158 = vector.shape_cast %154 : vector<32x8xf32> to vector<1x32x8xf32>
    tpu.vector_store %arg4[%c0_73, %c0_74, %c224], %158 {strides = array<i32>} : memref<1x32x256xf32, #tpu.memory_space<vmem>>, vector<1x32x8xf32>,
    %c0_75 = arith.constant 0 : index
    %c0_76 = arith.constant 0 : index
    %c232 = arith.constant 232 : index
    %159 = vector.load %arg4[%c0_75, %c0_76, %c232] : memref<1x32x256xf32, #tpu.memory_space<vmem>>, vector<1x32x8xf32>
    %160 = vector.shape_cast %159 : vector<1x32x8xf32> to vector<32x8xf32>
    %161 = vector.shape_cast %155 : vector<32x8xf32> to vector<1x32x8xf32>
    tpu.vector_store %arg4[%c0_75, %c0_76, %c232], %161 {strides = array<i32>} : memref<1x32x256xf32, #tpu.memory_space<vmem>>, vector<1x32x8xf32>,
    %162 = vector.extract_strided_slice %33 {offsets = [0, 120], sizes = [32, 8], strides = [1, 1]} : vector<32x128xf32> to vector<32x8xf32>
    %163 = vector.extract_strided_slice %41 {offsets = [0, 120], sizes = [32, 8], strides = [1, 1]} : vector<32x128xf32> to vector<32x8xf32>
    %c0_77 = arith.constant 0 : index
    %c0_78 = arith.constant 0 : index
    %c240 = arith.constant 240 : index
    %164 = vector.load %arg4[%c0_77, %c0_78, %c240] : memref<1x32x256xf32, #tpu.memory_space<vmem>>, vector<1x32x8xf32>
    %165 = vector.shape_cast %164 : vector<1x32x8xf32> to vector<32x8xf32>
    %166 = vector.shape_cast %162 : vector<32x8xf32> to vector<1x32x8xf32>
    tpu.vector_store %arg4[%c0_77, %c0_78, %c240], %166 {strides = array<i32>} : memref<1x32x256xf32, #tpu.memory_space<vmem>>, vector<1x32x8xf32>,
    %c0_79 = arith.constant 0 : index
    %c0_80 = arith.constant 0 : index
    %c248 = arith.constant 248 : index
    %167 = vector.load %arg4[%c0_79, %c0_80, %c248] : memref<1x32x256xf32, #tpu.memory_space<vmem>>, vector<1x32x8xf32>
    %168 = vector.shape_cast %167 : vector<1x32x8xf32> to vector<32x8xf32>
    %169 = vector.shape_cast %163 : vector<32x8xf32> to vector<1x32x8xf32>
    tpu.vector_store %arg4[%c0_79, %c0_80, %c248], %169 {strides = array<i32>} : memref<1x32x256xf32, #tpu.memory_space<vmem>>, vector<1x32x8xf32>,
    return
  }
  func.func @transform_0(%arg0: i32) -> (i32, i32, i32) {
    %c0_i32 = arith.constant 0 : i32
    %c0_i32_0 = arith.constant 0 : i32
    %c0_i32_1 = arith.constant 0 : i32
    return %arg0, %c0_i32, %c0_i32_0 : i32, i32, i32
  }
  func.func @transform_1(%arg0: i32) -> (i32, i32) {
    %c0_i32 = arith.constant 0 : i32
    %c0_i32_0 = arith.constant 0 : i32
    %c0_i32_1 = arith.constant 0 : i32
    return %c0_i32, %c0_i32_0 : i32, i32
  }
  func.func @transform_2(%arg0: i32) -> (i32, i32) {
    %c0_i32 = arith.constant 0 : i32
    %c0_i32_0 = arith.constant 0 : i32
    %c0_i32_1 = arith.constant 0 : i32
    return %c0_i32, %c0_i32_0 : i32, i32
  }
  func.func @transform_3(%arg0: i32) -> (i32, i32, i32) {
    %c0_i32 = arith.constant 0 : i32
    %c0_i32_0 = arith.constant 0 : i32
    %c0_i32_1 = arith.constant 0 : i32
    return %arg0, %c0_i32, %c0_i32_0 : i32, i32, i32
  }
}

</mosaic_0001>

<bundles_post_ra>
// kernel: upsample_noise_level.1
= control target key start
LH: loop header
LB: loop body
LE: loop exit
PB: predicated region body
PF: predicated region fallthrough
CT: control target
= control target key end

     0   :  { %s1234_s12 = smov 0   ;;  %s2029_s0 = inlined_call_operand.vmem [shape: bf16[2,32,128], index: 0, kind: input, shape index: {}]   ;;  %s2030_s1 = inlined_call_operand.vmem [shape: bf16[128,32], index: 1, kind: input, shape index: {}]   ;;  %s2031_s2 = inlined_call_operand.vmem [shape: f32[32,1], index: 2, kind: input, shape index: {}]   ;;  %s2032_s3 = inlined_call_operand.vmem [shape: f32[2,32,256], index: 3, kind: output, shape index: {}]  }
   0x1 LB: > { %s1057_s13 = sadd.s32 4294967295, %s1196_s12   ;;  %p1061_p0 = scmp.ge.s32.totalorder %s1196_s12, 1  ;;  %s1196_s12 = sphi %s1234_s12, %s13_s12  }
   0x2   : > { %p137_p1 = scmp.lt.s32.totalorder %s1196_s12, 3 }
   0x4   : > { %p138_p2 = pnand %p1061_p0, %p137_p1 }
   0x5   : > { %p161_p3 = scmp.lt.s32.totalorder (!%p138_p2), %s1057_s13, 1  ;;  %v1150_v0 = vld [vmem:[%s2030_s1] sm:$0xff] (!%p138_p2)   ;;  %vm252_vm0 = vcmask (!%p138_p2), 261120   ;;  %v1198_v2 = vmov (!%p138_p2), 0   ;;  %v189_v5 = vld [vmem:[%s2031_s2 + $0x8] sm:$0xff] (!%p138_p2)  ;;  %v190_v9 = vld [vmem:[%s2031_s2 + $0x10] sm:$0xff] (!%p138_p2)  ;;  %v192_v33 = vlaneseq (!%p138_p2) }
   0x6   : > { %141 = sbr.rel (%p138_p2) target bundleno = 744 (0x2e8), region = 32  ;;  %v1151_v1 = vld [vmem:[%s2030_s1 + $0x20] sm:$0xff] (!%p138_p2)   ;;  %1102 = vmatprep.mubr.msk.bf16.mxu0 (!%p138_p2), %vm252_vm0, %v1150_v0  ;;  %1147 = vset.pattern.permute.xlu1 (!%p138_p2), %v1198_v2  ;;  %v1152_v7 = vld [vmem:[%s2030_s1 + $0x8] sm:$0xff] (!%p138_p2)   ;;  %v1154_v10 = vld [vmem:[%s2030_s1 + $0x30] sm:$0xff] (!%p138_p2)   ;;  %s1199_s17 = smov (!%p138_p2), 8   ;;  %vm490_vm3 = vcmask (!%p138_p2), 64512  }
   0x7   : > { %1110 = vmatprep.mubr.msk.bf16.mxu1 (!%p138_p2), %vm252_vm0, %v1151_v1  ;;  %1146 = vset.pattern.permute.xlu0 (!%p138_p2), %v1198_v2  ;;  %v188_v6 = vld [vmem:[%s2031_s2] sm:$0xff] (!%p138_p2)  ;;  %v1153_v8 = vld [vmem:[%s2030_s1 + $0x28] sm:$0xff] (!%p138_p2)   ;;  %v1156_v11 = vld [vmem:[%s2030_s1 + $0x10] sm:$0xff] (!%p138_p2)   ;;  %v193_v34 = vand.u32 (!%p138_p2), 127, %v192_v33  ;;  %s1202_s23 = smov (!%p138_p2), 24   ;;  %s1203_s24 = smov (!%p138_p2), 32  }
   0x8   : > { %409 = vperm.xlu1 (!%p138_p2), %1147, %v189_v5   ;;  %404 = vperm.xlu0 (!%p138_p2), %1146, %v188_v6   ;;  %v191_v12 = vld [vmem:[%s2031_s2 + $0x18] sm:$0xff] (!%p138_p2)  ;;  %s1204_s25 = smov (!%p138_p2), 40   ;;  %s1205_s26 = smov (!%p138_p2), 48   ;;  %vm511_vm4 = vcmask (!%p138_p2), 130112   ;;  %vm532_vm5 = vcmask (!%p138_p2), 195712   ;;  %vm549_vm6 = vcmask (!%p138_p2), 261312  }
   0x9   : > { %v1155_v13 = vld [vmem:[%s2030_s1 + $0x38] sm:$0xff] (!%p138_p2)   ;;  %vm194_vm1 = vcmp.ge.s32.totalorder (!%p138_p2), %v193_v34, 8  ;;  %vm195_vm2 = vcmp.lt.s32.totalorder (!%p138_p2), %v193_v34, 120  ;;  %s1206_s27 = smov (!%p138_p2), 56   ;;  %s1207_s28 = smov (!%p138_p2), 64   ;;  %vm566_vm7 = vcmask (!%p138_p2), 326912  }
   0xa   : > { %v1157_v14 = vld [vmem:[%s2030_s1 + $0x18] sm:$0xff] (!%p138_p2)   ;;  %s1208_s29 = smov (!%p138_p2), 72   ;;  %s1209_s30 = smov (!%p138_p2), 80   ;;  %vm583_vm8 = vcmask (!%p138_p2), 392512   ;;  %vm600_vm9 = vcmask (!%p138_p2), 458112   ;;  %vm617_vm10 = vcmask (!%p138_p2), 523712  }
   0xb   : > { %s1210_s4 = smov (!%p138_p2), 88   ;;  %s1211_s5 = smov (!%p138_p2), 96   ;;  %vm634_vm11 = vcmask (!%p138_p2), 589312   ;;  %vm651_vm12 = vcmask (!%p138_p2), 654912   ;;  %vm668_vm13 = vcmask (!%p138_p2), 720512   ;;  %vm685_vm14 = vcmask (!%p138_p2), 786112  }
   0xc   : > { %414 = vperm.xlu1 (!%p138_p2), %1147, %v190_v9   ;;  %419 = vperm.xlu0 (!%p138_p2), %1146, %v191_v12   ;;  %s1212_s6 = smov (!%p138_p2), 104   ;;  %s1213_s7 = smov (!%p138_p2), 112   ;;  %vm702_vm15 = vcmask (!%p138_p2), 851712  }
   0xd   : > { %s2034_s13 = smov (!%p161_p3, %s1057_s13), 1 }
   0xe   : > { %s1086_s18 = sshll.u32 %s2034_s13, 4  ;;  %s1087_s19 = sshll.u32 %s2034_s13, 6 }
   0xf   : > { %s165_s21 = scalar_lea.vmem %s2029_s0, %s1086_s18  ;;  %s1200_s18 = smov 120  }
  0x10   : > { %v1148_v3 = vld [vmem:[%s165_s21] sm:$0xff]   ;;  %v1149_v4 = vld [vmem:[%s165_s21 + $0x8] sm:$0xff]   ;;  %s1334_s22 = scalar_lea.vmem %s2032_s3, %s1087_s19  ;;  %s1201_s13 = smov 16  }
  0x11   : > { %1098 = vmatprep.subr.bf16.mxu0 %v1148_v3  ;;  %1118 = vmatprep.subr.bf16.mxu1 %v1148_v3 }
  0x12   : > { %1099 = vmatpush3.bf16.msra.mxu0 %v1148_v3  ;;  %1120 = vmatpush3.bf16.msra.mxu1 %v1148_v3 }
  0x13   : > { %1100 = vmatprep.subr.bf16.mxu0 %v1149_v4  ;;  %1119 = vmatprep.subr.bf16.mxu1 %v1149_v4 }
  0x16   : > { %1101 = vmatpush3.bf16.msra.mxu0 %v1149_v4  ;;  %1121 = vmatpush3.bf16.msra.mxu1 %v1149_v4 }
  0x19   : > { %1103 = vmatmul.mubr.msk.bf16.vlgmr.msra.gmra.mrb[0].mxu0 %vm252_vm0, %v1152_v7  ;;  %1111 = vmatmul.mubr.msk.bf16.vlgmr.msra.gmra.mrb[0].mxu1 %vm252_vm0, %v1153_v8 }
  0x1a   : > { %1114 = vmatprep.mubr.msk.bf16.mxu1 %vm252_vm0, %v1154_v10  ;;  %1106 = vmatprep.mubr.msk.bf16.mxu0 %vm252_vm0, %v1156_v11 }
  0x21   : > { %1115 = vmatmul.mubr.msk.bf16.gmra.mrb[4].mxu1 %vm252_vm0, %v1155_v13  ;;  %1107 = vmatmul.mubr.msk.bf16.gmra.mrb[4].mxu0 %vm252_vm0, %v1157_v14  ;;  %vm719_vm0 = vcmask 917312  }
  0x87   : > { %v1304_v31 = vpop.permute.xlu0 %404  ;;  %v1306_v32 = vpop.permute.xlu1 %409 }
  0x8b   : > { %v1308_v35 = vpop.permute.xlu0 %419  ;;  %v1310_v36 = vpop.permute.xlu1 %414 }
  0xec   : > { %v1104_v15 = vpop.f32.mrb[0].mxu0  ;;  %v1112_v16 = vpop.f32.mrb[0].mxu1 }
  0xed   : > { %378 = vrot.lane.b32.xlu1 %v1104_v15, %s1199_s17  ;;  %v311_v17 = vpop.f32.mrb[1].mxu0  ;;  %v1293_v18 = vpop.f32.mrb[1].mxu1 }
  0xee   : > { %374 = vrot.lane.b32.xlu0 %v311_v17, %s1199_s17  ;;  %v1105_v19 = vpop.f32.mrb[2].mxu0  ;;  %v1113_v20 = vpop.f32.mrb[2].mxu1 }
  0xef   : > { %v314_v21 = vpop.f32.mrb[3].mxu0  ;;  %v1296_v22 = vpop.f32.mrb[3].mxu1 }
  0xf1   : > { %380 = vrot.lane.b32.xlu1 %v1105_v19, %s1199_s17 }
  0xf2   : > { %376 = vrot.lane.b32.xlu0 %v314_v21, %s1199_s17 }
  0xf4   : > { %v1116_v23 = vpop.f32.mrb[4].mxu1  ;;  %v1108_v24 = vpop.f32.mrb[4].mxu0 }
  0xf5   : > { %v359_v25 = vpop.f32.mrb[5].mxu1  ;;  %v327_v26 = vpop.f32.mrb[5].mxu0 }
  0xf6   : > { %v1117_v27 = vpop.f32.mrb[6].mxu1  ;;  %390 = vrot.lane.b32.xlu0 %v1116_v23, %s1200_s18  ;;  %v1109_v28 = vpop.f32.mrb[6].mxu0 }
  0xf7   : > { %392 = vrot.lane.b32.xlu1 %v1117_v27, %s1200_s18  ;;  %v362_v29 = vpop.f32.mrb[7].mxu1  ;;  %v330_v30 = vpop.f32.mrb[7].mxu0 }
  0xfa   : > { %386 = vrot.lane.b32.xlu0 %v359_v25, %s1200_s18 }
  0xfb   : > { %388 = vrot.lane.b32.xlu1 %v362_v29, %s1200_s18 }
 0x15f   : > { %v379_v37 = vpop.permute.xlu1 %378 }
 0x160   : > { %v384_v38 = vsel %vm194_vm1, %v379_v37, 0.0  ;;  %v375_v39 = vpop.permute.xlu0 %374 }
 0x161   : > { %v400_v40 = vadd.f32 %v1108_v24, %v384_v38  ;;  %v382_v41 = vsel %vm194_vm1, %v375_v39, 0.0 }
 0x162   : > { %v398_v42 = vadd.f32 %v382_v41, %v327_v26 }
 0x163   : > { %v424_v43 = vadd.f32 %v1310_v36, %v400_v40  ;;  %v381_v44 = vpop.permute.xlu1 %380 }
 0x164   : > { %v422_v45 = vadd.f32 %v1304_v31, %v398_v42  ;;  %v385_v46 = vsel %vm194_vm1, %v381_v44, 0.0  ;;  %v377_v47 = vpop.permute.xlu0 %376 }
 0x165   : > { %v436_v48 = vsub.f32 0.0, %v424_v43  ;;  %v401_v49 = vadd.f32 %v1109_v28, %v385_v46  ;;  %v383_v50 = vsel %vm194_vm1, %v377_v47, 0.0  ;;  %vm736_vm1 = vcmask 982912  }
 0x166   : > { %v434_v51 = vsub.f32 0.0, %v422_v45  ;;  %v399_v52 = vadd.f32 %v383_v50, %v330_v30 }
 0x167   : > { %v442_v53 = vmul.f32 1.442695, %v436_v48  ;;  %v425_v54 = vadd.f32 %v1308_v35, %v401_v49 }
 0x168   : > { %v438_v55 = vmul.f32 1.442695, %v434_v51  ;;  %v423_v56 = vadd.f32 %v1306_v32, %v399_v52  ;;  %v391_v57 = vpop.permute.xlu0 %390 }
 0x169   : > { %1158 = vpow2.f32 %v442_v53  ;;  %v437_v58 = vsub.f32 0.0, %v425_v54  ;;  %v396_v59 = vsel %vm195_vm2, %v391_v57, 0.0  ;;  %v393_v60 = vpop.permute.xlu1 %392 }
 0x16a   : > { %1160 = vpow2.f32 %v438_v55  ;;  %v435_v61 = vsub.f32 0.0, %v423_v56  ;;  %v1317_v62 = vadd.f32 %v1112_v16, %v396_v59  ;;  %v397_v63 = vsel %vm195_vm2, %v393_v60, 0.0 }
 0x16b   : > { %v444_v0 = vmul.f32 1.442695, %v437_v58  ;;  %v1320_v1 = vadd.f32 %v1113_v20, %v397_v63 }
 0x16c   : > { %v440_v2 = vmul.f32 1.442695, %v435_v61  ;;  %v387_v3 = vpop.permute.xlu0 %386  ;;  %v432_v25 = vadd.f32 %v1317_v62, %v1310_v36 }
 0x16d   : > { %1162 = vpow2.f32 %v444_v0  ;;  %v394_v4 = vsel %vm195_vm2, %v387_v3, 0.0  ;;  %v389_v5 = vpop.permute.xlu1 %388  ;;  %v433_v27 = vadd.f32 %v1320_v1, %v1308_v35 }
 0x16e   : > { %1164 = vpow2.f32 %v440_v2  ;;  %v1324_v6 = vadd.f32 %v394_v4, %v1293_v18  ;;  %v395_v7 = vsel %vm195_vm2, %v389_v5, 0.0  ;;  %v464_v26 = vsub.f32 0.0, %v432_v25 }
 0x16f   : > { %v1328_v8 = vadd.f32 %v395_v7, %v1296_v22  ;;  %v465_v29 = vsub.f32 0.0, %v433_v27  ;;  %vm753_vm2 = vcmask 1048512  }
 0x170   : > { %v470_v28 = vmul.f32 1.442695, %v464_v26  ;;  %v430_v50 = vadd.f32 %v1324_v6, %v1304_v31 }
 0x171   : > { %v472_v30 = vmul.f32 1.442695, %v465_v29 }
 0x172   : > { %v462_v53 = vsub.f32 0.0, %v430_v50 }
 0x173   : > { %v1159_v9 = vpop.eup %1158 }
 0x174   : > { %v1161_v10 = vpop.eup %1160  ;;  %v448_v11 = vadd.f32 1.0, %v1159_v9 }
 0x175   : > { %v446_v12 = vadd.f32 1.0, %v1161_v10 }
 0x176   : > { %1166 = vrcp.f32 %v448_v11 }
 0x177   : > { %v1163_v13 = vpop.eup %1162  ;;  %1168 = vrcp.f32 %v446_v12 }
 0x178   : > { %v1165_v14 = vpop.eup %1164  ;;  %v449_v15 = vadd.f32 1.0, %v1163_v13 }
 0x179   : > { %v447_v16 = vadd.f32 1.0, %v1165_v14 }
 0x17a   : > { %1170 = vrcp.f32 %v449_v15 }
 0x17b   : > { %1172 = vrcp.f32 %v447_v16 }
 0x17c   : > { %1174 = vpow2.f32 %v470_v28 }
 0x17d   : > { %1176 = vpow2.f32 %v472_v30 }
 0x180   : > { %v1167_v17 = vpop.eup %1166 }
 0x181   : > { %v1169_v18 = vpop.eup %1168  ;;  %v1336_v19 = vmul.f32 %v1167_v17, %v424_v43 }
 0x182   : > { %v1338_v20 = vmul.f32 %v1169_v18, %v422_v45 }
 0x183   : > { %524 = vrot.lane.b32.xlu1 %v1336_v19, %s1199_s17  ;;  %493 = vst.msk [vmem:[%s1334_s22 + $0x20] sm:$0xff] %vm490_vm3, %v1336_v19 }
 0x184   : > { %v1171_v21 = vpop.eup %1170  ;;  %491 = vst.msk [vmem:[%s1334_s22] sm:$0xff] %vm490_vm3, %v1338_v20 }
 0x185   : > { %v1173_v22 = vpop.eup %1172  ;;  %v1348_v23 = vmul.f32 %v1171_v21, %v425_v54  ;;  %v431_v54 = vadd.f32 %v1328_v8, %v1306_v32 }
 0x186   : > { %v1350_v24 = vmul.f32 %v1173_v22, %v423_v56  ;;  %v1175_v33 = vpop.eup %1174  ;;  %v466_v56 = vmul.f32 1.442695, %v462_v53 }
 0x187   : > { %558 = vrot.lane.b32.xlu1 %v1336_v19, %s1201_s13  ;;  %526 = vrot.lane.b32.xlu0 %v1348_v23, %s1199_s17  ;;  %494 = vst.msk [vmem:[%s1334_s22 + $0x30] sm:$0xff] %vm490_vm3, %v1348_v23  ;;  %v476_v34 = vadd.f32 1.0, %v1175_v33  ;;  %v1177_v35 = vpop.eup %1176  ;;  %v463_v57 = vsub.f32 0.0, %v431_v54 }
 0x188   : > { %492 = vst.msk [vmem:[%s1334_s22 + $0x10] sm:$0xff] %vm490_vm3, %v1350_v24  ;;  %v477_v36 = vadd.f32 1.0, %v1177_v35 }
 0x189   : > { %1178 = vrcp.f32 %v476_v34  ;;  %v468_v59 = vmul.f32 1.442695, %v463_v57 }
 0x18a   : > { %1180 = vrcp.f32 %v477_v36 }
 0x18b   : > { %592 = vrot.lane.b32.xlu1 %v1336_v19, %s1202_s23  ;;  %560 = vrot.lane.b32.xlu0 %v1348_v23, %s1201_s13  ;;  %1182 = vpow2.f32 %v466_v56 }
 0x18c   : > { %1184 = vpow2.f32 %v468_v59 }
 0x18f   : > { %626 = vrot.lane.b32.xlu1 %v1336_v19, %s1203_s24  ;;  %594 = vrot.lane.b32.xlu0 %v1348_v23, %s1202_s23 }
 0x193   : > { %660 = vrot.lane.b32.xlu1 %v1336_v19, %s1204_s25  ;;  %628 = vrot.lane.b32.xlu0 %v1348_v23, %s1203_s24  ;;  %v1179_v37 = vpop.eup %1178 }
 0x194   : > { %v1474_v38 = vmul.f32 %v1179_v37, %v432_v25  ;;  %v1181_v40 = vpop.eup %1180 }
 0x195   : > { %v1482_v41 = vmul.f32 %v1181_v40, %v433_v27  ;;  %v1183_v0 = vpop.eup %1182 }
 0x196   : > { %v474_v3 = vadd.f32 1.0, %v1183_v0  ;;  %v1185_v4 = vpop.eup %1184 }
 0x197   : > { %694 = vrot.lane.b32.xlu1 %v1336_v19, %s1205_s26  ;;  %662 = vrot.lane.b32.xlu0 %v1348_v23, %s1204_s25  ;;  %v475_v7 = vadd.f32 1.0, %v1185_v4 }
 0x198   : > { %1186 = vrcp.f32 %v474_v3 }
 0x199   : > { %1188 = vrcp.f32 %v475_v7 }
 0x19b   : > { %728 = vrot.lane.b32.xlu1 %v1336_v19, %s1206_s27  ;;  %696 = vrot.lane.b32.xlu0 %v1348_v23, %s1205_s26 }
 0x19f   : > { %762 = vrot.lane.b32.xlu1 %v1336_v19, %s1207_s28  ;;  %730 = vrot.lane.b32.xlu0 %v1348_v23, %s1206_s27 }
 0x1a2   : > { %v1187_v14 = vpop.eup %1186 }
 0x1a3   : > { %794 = vrot.lane.b32.xlu1 %v1336_v19, %s1208_s29  ;;  %764 = vrot.lane.b32.xlu0 %v1348_v23, %s1207_s28  ;;  %v1600_v15 = vmul.f32 %v1187_v14, %v430_v50  ;;  %v1189_v18 = vpop.eup %1188 }
 0x1a7   : > { %826 = vrot.lane.b32.xlu1 %v1336_v19, %s1209_s30  ;;  %796 = vrot.lane.b32.xlu0 %v1348_v23, %s1208_s29 }
 0x1ab   : > { %858 = vrot.lane.b32.xlu1 %v1336_v19, %s1210_s4  ;;  %828 = vrot.lane.b32.xlu0 %v1348_v23, %s1209_s30 }
 0x1af   : > { %890 = vrot.lane.b32.xlu1 %v1336_v19, %s1211_s5  ;;  %860 = vrot.lane.b32.xlu0 %v1348_v23, %s1210_s4 }
 0x1b3   : > { %922 = vrot.lane.b32.xlu1 %v1336_v19, %s1212_s6  ;;  %892 = vrot.lane.b32.xlu0 %v1348_v23, %s1211_s5 }
 0x1b7   : > { %954 = vrot.lane.b32.xlu1 %v1336_v19, %s1213_s7  ;;  %924 = vrot.lane.b32.xlu0 %v1348_v23, %s1212_s6 }
 0x1bb   : > { %520 = vrot.lane.b32.xlu1 %v1338_v20, %s1199_s17  ;;  %956 = vrot.lane.b32.xlu0 %v1348_v23, %s1213_s7 }
 0x1bf   : > { %554 = vrot.lane.b32.xlu1 %v1338_v20, %s1201_s13  ;;  %522 = vrot.lane.b32.xlu0 %v1350_v24, %s1199_s17 }
 0x1c3   : > { %588 = vrot.lane.b32.xlu1 %v1338_v20, %s1202_s23  ;;  %556 = vrot.lane.b32.xlu0 %v1350_v24, %s1201_s13 }
 0x1c7   : > { %622 = vrot.lane.b32.xlu1 %v1338_v20, %s1203_s24  ;;  %590 = vrot.lane.b32.xlu0 %v1350_v24, %s1202_s23 }
 0x1cb   : > { %656 = vrot.lane.b32.xlu1 %v1338_v20, %s1204_s25  ;;  %624 = vrot.lane.b32.xlu0 %v1350_v24, %s1203_s24 }
 0x1cf   : > { %690 = vrot.lane.b32.xlu1 %v1338_v20, %s1205_s26  ;;  %658 = vrot.lane.b32.xlu0 %v1350_v24, %s1204_s25 }
 0x1d3   : > { %724 = vrot.lane.b32.xlu1 %v1338_v20, %s1206_s27  ;;  %692 = vrot.lane.b32.xlu0 %v1350_v24, %s1205_s26 }
 0x1d7   : > { %758 = vrot.lane.b32.xlu1 %v1338_v20, %s1207_s28  ;;  %726 = vrot.lane.b32.xlu0 %v1350_v24, %s1206_s27 }
 0x1db   : > { %790 = vrot.lane.b32.xlu1 %v1338_v20, %s1208_s29  ;;  %760 = vrot.lane.b32.xlu0 %v1350_v24, %s1207_s28 }
 0x1df   : > { %822 = vrot.lane.b32.xlu1 %v1338_v20, %s1209_s30  ;;  %792 = vrot.lane.b32.xlu0 %v1350_v24, %s1208_s29 }
 0x1e3   : > { %854 = vrot.lane.b32.xlu1 %v1338_v20, %s1210_s4  ;;  %824 = vrot.lane.b32.xlu0 %v1350_v24, %s1209_s30 }
 0x1e7   : > { %886 = vrot.lane.b32.xlu1 %v1338_v20, %s1211_s5  ;;  %856 = vrot.lane.b32.xlu0 %v1350_v24, %s1210_s4 }
 0x1eb   : > { %918 = vrot.lane.b32.xlu1 %v1338_v20, %s1212_s6  ;;  %888 = vrot.lane.b32.xlu0 %v1350_v24, %s1211_s5 }
 0x1ef   : > { %950 = vrot.lane.b32.xlu1 %v1338_v20, %s1213_s7  ;;  %920 = vrot.lane.b32.xlu0 %v1350_v24, %s1212_s6 }
 0x1f3   : > { %982 = vrot.lane.b32.xlu1 %v1338_v20, %s1200_s18  ;;  %952 = vrot.lane.b32.xlu0 %v1350_v24, %s1213_s7  ;;  %v1610_v20 = vmul.f32 %v1189_v18, %v431_v54 }
 0x1f5   : > { %v1476_v39 = vpop.permute.xlu1 %524 }
 0x1f7   : > { %503 = vrot.lane.b32.xlu1 %v1474_v38, %s1199_s17  ;;  %984 = vrot.lane.b32.xlu0 %v1350_v24, %s1200_s18 }
 0x1f9   : > { %v1484_v42 = vpop.permute.xlu1 %558  ;;  %v1486_v43 = vpop.permute.xlu0 %526 }
 0x1fb   : > { %541 = vrot.lane.b32.xlu1 %v1474_v38, %s1201_s13  ;;  %505 = vrot.lane.b32.xlu0 %v1482_v41, %s1199_s17 }
 0x1fd   : > { %v1492_v44 = vpop.permute.xlu1 %592  ;;  %v1494_v45 = vpop.permute.xlu0 %560 }
 0x1ff   : > { %575 = vrot.lane.b32.xlu1 %v1474_v38, %s1202_s23  ;;  %543 = vrot.lane.b32.xlu0 %v1482_v41, %s1201_s13 }
 0x201   : > { %v1500_v46 = vpop.permute.xlu1 %626  ;;  %v1502_v47 = vpop.permute.xlu0 %594 }
 0x203   : > { %609 = vrot.lane.b32.xlu1 %v1474_v38, %s1203_s24  ;;  %577 = vrot.lane.b32.xlu0 %v1482_v41, %s1202_s23 }
 0x205   : > { %v1508_v48 = vpop.permute.xlu1 %660  ;;  %v1510_v49 = vpop.permute.xlu0 %628 }
 0x207   : > { %643 = vrot.lane.b32.xlu1 %v1474_v38, %s1204_s25  ;;  %611 = vrot.lane.b32.xlu0 %v1482_v41, %s1203_s24 }
 0x209   : > { %v1518_v51 = vpop.permute.xlu1 %694  ;;  %v1520_v52 = vpop.permute.xlu0 %662 }
 0x20b   : > { %677 = vrot.lane.b32.xlu1 %v1474_v38, %s1205_s26  ;;  %645 = vrot.lane.b32.xlu0 %v1482_v41, %s1204_s25 }
 0x20d   : > { %v1528_v31 = vpop.permute.xlu1 %728  ;;  %v1530_v55 = vpop.permute.xlu0 %696 }
 0x20f   : > { %711 = vrot.lane.b32.xlu1 %v1474_v38, %s1206_s27  ;;  %679 = vrot.lane.b32.xlu0 %v1482_v41, %s1205_s26 }
 0x211   : > { %v763_v32 = vpop.permute.xlu1 %762  ;;  %v1536_v58 = vpop.permute.xlu0 %730 }
 0x212   : > { %772 = vst.msk [vmem:[%s1334_s22 + $0x28] sm:$0xff] %vm490_vm3, %v763_v32 }
 0x213   : > { %745 = vrot.lane.b32.xlu1 %v1474_v38, %s1207_s28  ;;  %713 = vrot.lane.b32.xlu0 %v1482_v41, %s1206_s27 }
 0x215   : > { %v1544_v60 = vpop.permute.xlu1 %794  ;;  %v765_v61 = vpop.permute.xlu0 %764 }
 0x216   : > { %773 = vst.msk [vmem:[%s1334_s22 + $0x38] sm:$0xff] %vm490_vm3, %v765_v61 }
 0x217   : > { %778 = vrot.lane.b32.xlu1 %v1474_v38, %s1208_s29  ;;  %747 = vrot.lane.b32.xlu0 %v1482_v41, %s1207_s28 }
 0x219   : > { %v1552_v62 = vpop.permute.xlu1 %826  ;;  %v1554_v63 = vpop.permute.xlu0 %796 }
 0x21b   : > { %810 = vrot.lane.b32.xlu1 %v1474_v38, %s1209_s30  ;;  %780 = vrot.lane.b32.xlu0 %v1482_v41, %s1208_s29 }
 0x21d   : > { %v1560_v1 = vpop.permute.xlu1 %858  ;;  %v1562_v2 = vpop.permute.xlu0 %828 }
 0x21f   : > { %842 = vrot.lane.b32.xlu1 %v1474_v38, %s1210_s4  ;;  %812 = vrot.lane.b32.xlu0 %v1482_v41, %s1209_s30 }
 0x221   : > { %v1568_v5 = vpop.permute.xlu1 %890  ;;  %v1570_v6 = vpop.permute.xlu0 %860 }
 0x223   : > { %874 = vrot.lane.b32.xlu1 %v1474_v38, %s1211_s5  ;;  %844 = vrot.lane.b32.xlu0 %v1482_v41, %s1210_s4 }
 0x225   : > { %v1576_v8 = vpop.permute.xlu1 %922  ;;  %v1578_v9 = vpop.permute.xlu0 %892 }
 0x227   : > { %906 = vrot.lane.b32.xlu1 %v1474_v38, %s1212_s6  ;;  %876 = vrot.lane.b32.xlu0 %v1482_v41, %s1211_s5 }
 0x229   : > { %v1584_v10 = vpop.permute.xlu1 %954  ;;  %v1586_v11 = vpop.permute.xlu0 %924 }
 0x22b   : > { %938 = vrot.lane.b32.xlu1 %v1474_v38, %s1213_s7  ;;  %908 = vrot.lane.b32.xlu0 %v1482_v41, %s1212_s6 }
 0x22d   : > { %v1592_v12 = vpop.permute.xlu1 %520  ;;  %v1594_v13 = vpop.permute.xlu0 %956 }
 0x22f   : > { %970 = vrot.lane.b32.xlu1 %v1474_v38, %s1200_s18  ;;  %940 = vrot.lane.b32.xlu0 %v1482_v41, %s1213_s7 }
 0x231   : > { %v1602_v16 = vpop.permute.xlu1 %554  ;;  %v1604_v17 = vpop.permute.xlu0 %522 }
 0x233   : > { %499 = vrot.lane.b32.xlu1 %v1600_v15, %s1199_s17  ;;  %972 = vrot.lane.b32.xlu0 %v1482_v41, %s1200_s18 }
 0x235   : > { %v1612_v21 = vpop.permute.xlu1 %588  ;;  %v1614_v22 = vpop.permute.xlu0 %556 }
 0x237   : > { %537 = vrot.lane.b32.xlu1 %v1600_v15, %s1201_s13  ;;  %501 = vrot.lane.b32.xlu0 %v1610_v20, %s1199_s17 }
 0x239   : > { %v1620_v24 = vpop.permute.xlu1 %622  ;;  %v1622_v25 = vpop.permute.xlu0 %590 }
 0x23b   : > { %571 = vrot.lane.b32.xlu1 %v1600_v15, %s1202_s23  ;;  %539 = vrot.lane.b32.xlu0 %v1610_v20, %s1201_s13 }
 0x23d   : > { %v1628_v26 = vpop.permute.xlu1 %656  ;;  %v1630_v27 = vpop.permute.xlu0 %624 }
 0x23f   : > { %605 = vrot.lane.b32.xlu1 %v1600_v15, %s1203_s24  ;;  %573 = vrot.lane.b32.xlu0 %v1610_v20, %s1202_s23 }
 0x241   : > { %v1636_v28 = vpop.permute.xlu1 %690  ;;  %v1638_v29 = vpop.permute.xlu0 %658 }
 0x243   : > { %639 = vrot.lane.b32.xlu1 %v1600_v15, %s1204_s25  ;;  %607 = vrot.lane.b32.xlu0 %v1610_v20, %s1203_s24 }
 0x245   : > { %v1644_v30 = vpop.permute.xlu1 %724  ;;  %v1646_v33 = vpop.permute.xlu0 %692 }
 0x247   : > { %673 = vrot.lane.b32.xlu1 %v1600_v15, %s1205_s26  ;;  %641 = vrot.lane.b32.xlu0 %v1610_v20, %s1204_s25 }
 0x249   : > { %v759_v34 = vpop.permute.xlu1 %758  ;;  %v1652_v35 = vpop.permute.xlu0 %726 }
 0x24a   : > { %770 = vst.msk [vmem:[%s1334_s22 + $0x8] sm:$0xff] %vm490_vm3, %v759_v34 }
 0x24b   : > { %707 = vrot.lane.b32.xlu1 %v1600_v15, %s1206_s27  ;;  %675 = vrot.lane.b32.xlu0 %v1610_v20, %s1205_s26 }
 0x24d   : > { %v1660_v36 = vpop.permute.xlu1 %790  ;;  %v761_v37 = vpop.permute.xlu0 %760 }
 0x24e   : > { %771 = vst.msk [vmem:[%s1334_s22 + $0x18] sm:$0xff] %vm490_vm3, %v761_v37 }
 0x24f   : > { %741 = vrot.lane.b32.xlu1 %v1600_v15, %s1207_s28  ;;  %709 = vrot.lane.b32.xlu0 %v1610_v20, %s1206_s27 }
 0x251   : > { %v1668_v40 = vpop.permute.xlu1 %822  ;;  %v1670_v50 = vpop.permute.xlu0 %792 }
 0x253   : > { %774 = vrot.lane.b32.xlu1 %v1600_v15, %s1208_s29  ;;  %743 = vrot.lane.b32.xlu0 %v1610_v20, %s1207_s28 }
 0x255   : > { %v1676_v53 = vpop.permute.xlu1 %854  ;;  %v1678_v54 = vpop.permute.xlu0 %824 }
 0x257   : > { %806 = vrot.lane.b32.xlu1 %v1600_v15, %s1209_s30  ;;  %776 = vrot.lane.b32.xlu0 %v1610_v20, %s1208_s29 }
 0x259   : > { %v1684_v56 = vpop.permute.xlu1 %886  ;;  %v1686_v57 = vpop.permute.xlu0 %856 }
 0x25b   : > { %838 = vrot.lane.b32.xlu1 %v1600_v15, %s1210_s4  ;;  %808 = vrot.lane.b32.xlu0 %v1610_v20, %s1209_s30 }
 0x25d   : > { %v1692_v32 = vpop.permute.xlu1 %918  ;;  %v1694_v59 = vpop.permute.xlu0 %888 }
 0x25f   : > { %870 = vrot.lane.b32.xlu1 %v1600_v15, %s1211_s5  ;;  %840 = vrot.lane.b32.xlu0 %v1610_v20, %s1210_s4 }
 0x261   : > { %v1700_v61 = vpop.permute.xlu1 %950  ;;  %v1702_v0 = vpop.permute.xlu0 %920 }
 0x263   : > { %902 = vrot.lane.b32.xlu1 %v1600_v15, %s1212_s6  ;;  %872 = vrot.lane.b32.xlu0 %v1610_v20, %s1211_s5 }
 0x265   : > { %v1708_v3 = vpop.permute.xlu1 %982  ;;  %v1710_v4 = vpop.permute.xlu0 %952 }
 0x267   : > { %934 = vrot.lane.b32.xlu1 %v1600_v15, %s1213_s7  ;;  %904 = vrot.lane.b32.xlu0 %v1610_v20, %s1212_s6 }
 0x269   : > { %v504_v7 = vpop.permute.xlu1 %503  ;;  %v1716_v14 = vpop.permute.xlu0 %984 }
 0x26a   : > { %514 = vst.msk [vmem:[%s1334_s22 + $0x20] sm:$0xff] %vm511_vm4, %v504_v7 }
 0x26b   : > { %966 = vrot.lane.b32.xlu1 %v1600_v15, %s1200_s18  ;;  %936 = vrot.lane.b32.xlu0 %v1610_v20, %s1213_s7  ;;  %535 = vst.msk [vmem:[%s1334_s22 + $0x20] sm:$0xff] %vm532_vm5, %v1476_v39 }
 0x26d   : > { %v542_v18 = vpop.permute.xlu1 %541  ;;  %v506_v34 = vpop.permute.xlu0 %505 }
 0x26e   : > { %552 = vst.msk [vmem:[%s1334_s22 + $0x20] sm:$0xff] %vm549_vm6, %v542_v18 }
 0x26f   : > { %515 = vst.msk [vmem:[%s1334_s22 + $0x30] sm:$0xff] %vm511_vm4, %v506_v34  ;;  %986 = vrot.lane.b32.xlu1 %v1336_v19, %s1200_s18  ;;  %968 = vrot.lane.b32.xlu0 %v1610_v20, %s1200_s18 }
 0x270   : > { %536 = vst.msk [vmem:[%s1334_s22 + $0x30] sm:$0xff] %vm532_vm5, %v1486_v43 }
 0x271   : > { %569 = vst.msk [vmem:[%s1334_s22 + $0x20] sm:$0xff] %vm566_vm7, %v1484_v42  ;;  %v576_v39 = vpop.permute.xlu1 %575  ;;  %v544_v37 = vpop.permute.xlu0 %543 }
 0x272   : > { %586 = vst.msk [vmem:[%s1334_s22 + $0x20] sm:$0xff] %vm583_vm8, %v576_v39 }
 0x273   : > { %553 = vst.msk [vmem:[%s1334_s22 + $0x30] sm:$0xff] %vm549_vm6, %v544_v37  ;;  %988 = vrot.lane.b32.xlu0 %v1348_v23, %s1200_s18 }
 0x274   : > { %570 = vst.msk [vmem:[%s1334_s22 + $0x30] sm:$0xff] %vm566_vm7, %v1494_v45 }
 0x275   : > { %603 = vst.msk [vmem:[%s1334_s22 + $0x20] sm:$0xff] %vm600_vm9, %v1492_v44  ;;  %v610_v19 = vpop.permute.xlu1 %609  ;;  %v578_v42 = vpop.permute.xlu0 %577 }
 0x276   : > { %620 = vst.msk [vmem:[%s1334_s22 + $0x20] sm:$0xff] %vm617_vm10, %v610_v19 }
 0x277   : > { %587 = vst.msk [vmem:[%s1334_s22 + $0x30] sm:$0xff] %vm583_vm8, %v578_v42 }
 0x278   : > { %604 = vst.msk [vmem:[%s1334_s22 + $0x30] sm:$0xff] %vm600_vm9, %v1502_v47 }
 0x279   : > { %637 = vst.msk [vmem:[%s1334_s22 + $0x20] sm:$0xff] %vm634_vm11, %v1500_v46  ;;  %v644_v23 = vpop.permute.xlu1 %643  ;;  %v612_v43 = vpop.permute.xlu0 %611 }
 0x27a   : > { %654 = vst.msk [vmem:[%s1334_s22 + $0x20] sm:$0xff] %vm651_vm12, %v644_v23 }
 0x27b   : > { %621 = vst.msk [vmem:[%s1334_s22 + $0x30] sm:$0xff] %vm617_vm10, %v612_v43 }
 0x27c   : > { %638 = vst.msk [vmem:[%s1334_s22 + $0x30] sm:$0xff] %vm634_vm11, %v1510_v49 }
 0x27d   : > { %671 = vst.msk [vmem:[%s1334_s22 + $0x20] sm:$0xff] %vm668_vm13, %v1508_v48  ;;  %v678_v44 = vpop.permute.xlu1 %677  ;;  %v646_v45 = vpop.permute.xlu0 %645 }
 0x27e   : > { %688 = vst.msk [vmem:[%s1334_s22 + $0x20] sm:$0xff] %vm685_vm14, %v678_v44 }
 0x27f   : > { %655 = vst.msk [vmem:[%s1334_s22 + $0x30] sm:$0xff] %vm651_vm12, %v646_v45 }
 0x280   : > { %672 = vst.msk [vmem:[%s1334_s22 + $0x30] sm:$0xff] %vm668_vm13, %v1520_v52 }
 0x281   : > { %705 = vst.msk [vmem:[%s1334_s22 + $0x20] sm:$0xff] %vm702_vm15, %v1518_v51  ;;  %v712_v46 = vpop.permute.xlu1 %711  ;;  %v680_v47 = vpop.permute.xlu0 %679 }
 0x282   : > { %722 = vst.msk [vmem:[%s1334_s22 + $0x20] sm:$0xff] %vm719_vm0, %v712_v46 }
 0x283   : > { %689 = vst.msk [vmem:[%s1334_s22 + $0x30] sm:$0xff] %vm685_vm14, %v680_v47 }
 0x284   : > { %706 = vst.msk [vmem:[%s1334_s22 + $0x30] sm:$0xff] %vm702_vm15, %v1530_v55 }
 0x285   : > { %739 = vst.msk [vmem:[%s1334_s22 + $0x20] sm:$0xff] %vm736_vm1, %v1528_v31  ;;  %v746_v48 = vpop.permute.xlu1 %745  ;;  %v714_v49 = vpop.permute.xlu0 %713 }
 0x286   : > { %756 = vst.msk [vmem:[%s1334_s22 + $0x20] sm:$0xff] %vm753_vm2, %v746_v48 }
 0x287   : > { %723 = vst.msk [vmem:[%s1334_s22 + $0x30] sm:$0xff] %vm719_vm0, %v714_v49 }
 0x288   : > { %740 = vst.msk [vmem:[%s1334_s22 + $0x30] sm:$0xff] %vm736_vm1, %v1536_v58 }
 0x289   : > { %v779_v51 = vpop.permute.xlu1 %778  ;;  %v748_v52 = vpop.permute.xlu0 %747 }
 0x28a   : > { %788 = vst.msk [vmem:[%s1334_s22 + $0x28] sm:$0xff] %vm511_vm4, %v779_v51 }
 0x28b   : > { %757 = vst.msk [vmem:[%s1334_s22 + $0x30] sm:$0xff] %vm753_vm2, %v748_v52 }
 0x28c   : > { %804 = vst.msk [vmem:[%s1334_s22 + $0x28] sm:$0xff] %vm532_vm5, %v1544_v60 }
 0x28d   : > { %v811_v31 = vpop.permute.xlu1 %810  ;;  %v781_v55 = vpop.permute.xlu0 %780 }
 0x28e   : > { %820 = vst.msk [vmem:[%s1334_s22 + $0x28] sm:$0xff] %vm549_vm6, %v811_v31 }
 0x28f   : > { %789 = vst.msk [vmem:[%s1334_s22 + $0x38] sm:$0xff] %vm511_vm4, %v781_v55 }
 0x290   : > { %836 = vst.msk [vmem:[%s1334_s22 + $0x28] sm:$0xff] %vm566_vm7, %v1552_v62 }
 0x291   : > { %805 = vst.msk [vmem:[%s1334_s22 + $0x38] sm:$0xff] %vm532_vm5, %v1554_v63  ;;  %v843_v58 = vpop.permute.xlu1 %842  ;;  %v813_v60 = vpop.permute.xlu0 %812 }
 0x292   : > { %852 = vst.msk [vmem:[%s1334_s22 + $0x28] sm:$0xff] %vm583_vm8, %v843_v58 }
 0x293   : > { %821 = vst.msk [vmem:[%s1334_s22 + $0x38] sm:$0xff] %vm549_vm6, %v813_v60 }
 0x294   : > { %868 = vst.msk [vmem:[%s1334_s22 + $0x28] sm:$0xff] %vm600_vm9, %v1560_v1 }
 0x295   : > { %837 = vst.msk [vmem:[%s1334_s22 + $0x38] sm:$0xff] %vm566_vm7, %v1562_v2  ;;  %v875_v62 = vpop.permute.xlu1 %874  ;;  %v845_v63 = vpop.permute.xlu0 %844 }
 0x296   : > { %884 = vst.msk [vmem:[%s1334_s22 + $0x28] sm:$0xff] %vm617_vm10, %v875_v62 }
 0x297   : > { %853 = vst.msk [vmem:[%s1334_s22 + $0x38] sm:$0xff] %vm583_vm8, %v845_v63 }
 0x298   : > { %900 = vst.msk [vmem:[%s1334_s22 + $0x28] sm:$0xff] %vm634_vm11, %v1568_v5 }
 0x299   : > { %869 = vst.msk [vmem:[%s1334_s22 + $0x38] sm:$0xff] %vm600_vm9, %v1570_v6  ;;  %v907_v1 = vpop.permute.xlu1 %906  ;;  %v877_v2 = vpop.permute.xlu0 %876 }
 0x29a   : > { %916 = vst.msk [vmem:[%s1334_s22 + $0x28] sm:$0xff] %vm651_vm12, %v907_v1 }
 0x29b   : > { %885 = vst.msk [vmem:[%s1334_s22 + $0x38] sm:$0xff] %vm617_vm10, %v877_v2 }
 0x29c   : > { %932 = vst.msk [vmem:[%s1334_s22 + $0x28] sm:$0xff] %vm668_vm13, %v1576_v8 }
 0x29d   : > { %901 = vst.msk [vmem:[%s1334_s22 + $0x38] sm:$0xff] %vm634_vm11, %v1578_v9  ;;  %v939_v5 = vpop.permute.xlu1 %938  ;;  %v909_v7 = vpop.permute.xlu0 %908 }
 0x29e   : > { %948 = vst.msk [vmem:[%s1334_s22 + $0x28] sm:$0xff] %vm685_vm14, %v939_v5 }
 0x29f   : > { %917 = vst.msk [vmem:[%s1334_s22 + $0x38] sm:$0xff] %vm651_vm12, %v909_v7 }
 0x2a0   : > { %964 = vst.msk [vmem:[%s1334_s22 + $0x28] sm:$0xff] %vm702_vm15, %v1584_v10 }
 0x2a1   : > { %933 = vst.msk [vmem:[%s1334_s22 + $0x38] sm:$0xff] %vm668_vm13, %v1586_v11  ;;  %v971_v6 = vpop.permute.xlu1 %970  ;;  %v941_v8 = vpop.permute.xlu0 %940 }
 0x2a2   : > { %980 = vst.msk [vmem:[%s1334_s22 + $0x28] sm:$0xff] %vm719_vm0, %v971_v6 }
 0x2a3   : > { %949 = vst.msk [vmem:[%s1334_s22 + $0x38] sm:$0xff] %vm685_vm14, %v941_v8 }
 0x2a4   : > { %965 = vst.msk [vmem:[%s1334_s22 + $0x38] sm:$0xff] %vm702_vm15, %v1594_v13 }
 0x2a5   : > { %v500_v9 = vpop.permute.xlu1 %499  ;;  %v973_v10 = vpop.permute.xlu0 %972 }
 0x2a6   : > { %512 = vst.msk [vmem:[%s1334_s22] sm:$0xff] %vm511_vm4, %v500_v9 }
 0x2a7   : > { %981 = vst.msk [vmem:[%s1334_s22 + $0x38] sm:$0xff] %vm719_vm0, %v973_v10 }
 0x2a8   : > { %533 = vst.msk [vmem:[%s1334_s22] sm:$0xff] %vm532_vm5, %v1592_v12 }
 0x2a9   : > { %v538_v11 = vpop.permute.xlu1 %537  ;;  %v502_v18 = vpop.permute.xlu0 %501 }
 0x2aa   : > { %550 = vst.msk [vmem:[%s1334_s22] sm:$0xff] %vm549_vm6, %v538_v11 }
 0x2ab   : > { %513 = vst.msk [vmem:[%s1334_s22 + $0x10] sm:$0xff] %vm511_vm4, %v502_v18 }
 0x2ac   : > { %567 = vst.msk [vmem:[%s1334_s22] sm:$0xff] %vm566_vm7, %v1602_v16 }
 0x2ad   : > { %534 = vst.msk [vmem:[%s1334_s22 + $0x10] sm:$0xff] %vm532_vm5, %v1604_v17  ;;  %v572_v13 = vpop.permute.xlu1 %571  ;;  %v540_v12 = vpop.permute.xlu0 %539 }
 0x2ae   : > { %584 = vst.msk [vmem:[%s1334_s22] sm:$0xff] %vm583_vm8, %v572_v13 }
 0x2af   : > { %551 = vst.msk [vmem:[%s1334_s22 + $0x10] sm:$0xff] %vm549_vm6, %v540_v12 }
 0x2b0   : > { %601 = vst.msk [vmem:[%s1334_s22] sm:$0xff] %vm600_vm9, %v1612_v21 }
 0x2b1   : > { %568 = vst.msk [vmem:[%s1334_s22 + $0x10] sm:$0xff] %vm566_vm7, %v1614_v22  ;;  %v606_v16 = vpop.permute.xlu1 %605  ;;  %v574_v17 = vpop.permute.xlu0 %573 }
 0x2b2   : > { %618 = vst.msk [vmem:[%s1334_s22] sm:$0xff] %vm617_vm10, %v606_v16 }
 0x2b3   : > { %585 = vst.msk [vmem:[%s1334_s22 + $0x10] sm:$0xff] %vm583_vm8, %v574_v17 }
 0x2b4   : > { %635 = vst.msk [vmem:[%s1334_s22] sm:$0xff] %vm634_vm11, %v1620_v24 }
 0x2b5   : > { %602 = vst.msk [vmem:[%s1334_s22 + $0x10] sm:$0xff] %vm600_vm9, %v1622_v25  ;;  %v640_v21 = vpop.permute.xlu1 %639  ;;  %v608_v22 = vpop.permute.xlu0 %607 }
 0x2b6   : > { %652 = vst.msk [vmem:[%s1334_s22] sm:$0xff] %vm651_vm12, %v640_v21 }
 0x2b7   : > { %619 = vst.msk [vmem:[%s1334_s22 + $0x10] sm:$0xff] %vm617_vm10, %v608_v22 }
 0x2b8   : > { %669 = vst.msk [vmem:[%s1334_s22] sm:$0xff] %vm668_vm13, %v1628_v26 }
 0x2b9   : > { %636 = vst.msk [vmem:[%s1334_s22 + $0x10] sm:$0xff] %vm634_vm11, %v1630_v27  ;;  %v674_v24 = vpop.permute.xlu1 %673  ;;  %v642_v25 = vpop.permute.xlu0 %641 }
 0x2ba   : > { %686 = vst.msk [vmem:[%s1334_s22] sm:$0xff] %vm685_vm14, %v674_v24 }
 0x2bb   : > { %653 = vst.msk [vmem:[%s1334_s22 + $0x10] sm:$0xff] %vm651_vm12, %v642_v25 }
 0x2bc   : > { %703 = vst.msk [vmem:[%s1334_s22] sm:$0xff] %vm702_vm15, %v1636_v28 }
 0x2bd   : > { %670 = vst.msk [vmem:[%s1334_s22 + $0x10] sm:$0xff] %vm668_vm13, %v1638_v29  ;;  %v708_v26 = vpop.permute.xlu1 %707  ;;  %v676_v34 = vpop.permute.xlu0 %675 }
 0x2be   : > { %720 = vst.msk [vmem:[%s1334_s22] sm:$0xff] %vm719_vm0, %v708_v26 }
 0x2bf   : > { %687 = vst.msk [vmem:[%s1334_s22 + $0x10] sm:$0xff] %vm685_vm14, %v676_v34 }
 0x2c0   : > { %737 = vst.msk [vmem:[%s1334_s22] sm:$0xff] %vm736_vm1, %v1644_v30 }
 0x2c1   : > { %704 = vst.msk [vmem:[%s1334_s22 + $0x10] sm:$0xff] %vm702_vm15, %v1646_v33  ;;  %v742_v27 = vpop.permute.xlu1 %741  ;;  %v710_v28 = vpop.permute.xlu0 %709 }
 0x2c2   : > { %754 = vst.msk [vmem:[%s1334_s22] sm:$0xff] %vm753_vm2, %v742_v27 }
 0x2c3   : > { %721 = vst.msk [vmem:[%s1334_s22 + $0x10] sm:$0xff] %vm719_vm0, %v710_v28 }
 0x2c4   : > { %738 = vst.msk [vmem:[%s1334_s22 + $0x10] sm:$0xff] %vm736_vm1, %v1652_v35 }
 0x2c5   : > { %v775_v29 = vpop.permute.xlu1 %774  ;;  %v744_v30 = vpop.permute.xlu0 %743 }
 0x2c6   : > { %786 = vst.msk [vmem:[%s1334_s22 + $0x8] sm:$0xff] %vm511_vm4, %v775_v29 }
 0x2c7   : > { %755 = vst.msk [vmem:[%s1334_s22 + $0x10] sm:$0xff] %vm753_vm2, %v744_v30 }
 0x2c8   : > { %802 = vst.msk [vmem:[%s1334_s22 + $0x8] sm:$0xff] %vm532_vm5, %v1660_v36 }
 0x2c9   : > { %v807_v33 = vpop.permute.xlu1 %806  ;;  %v777_v39 = vpop.permute.xlu0 %776 }
 0x2ca   : > { %818 = vst.msk [vmem:[%s1334_s22 + $0x8] sm:$0xff] %vm549_vm6, %v807_v33 }
 0x2cb   : > { %787 = vst.msk [vmem:[%s1334_s22 + $0x18] sm:$0xff] %vm511_vm4, %v777_v39 }
 0x2cc   : > { %834 = vst.msk [vmem:[%s1334_s22 + $0x8] sm:$0xff] %vm566_vm7, %v1668_v40 }
 0x2cd   : > { %803 = vst.msk [vmem:[%s1334_s22 + $0x18] sm:$0xff] %vm532_vm5, %v1670_v50  ;;  %v839_v35 = vpop.permute.xlu1 %838  ;;  %v809_v36 = vpop.permute.xlu0 %808 }
 0x2ce   : > { %850 = vst.msk [vmem:[%s1334_s22 + $0x8] sm:$0xff] %vm583_vm8, %v839_v35 }
 0x2cf   : > { %819 = vst.msk [vmem:[%s1334_s22 + $0x18] sm:$0xff] %vm549_vm6, %v809_v36 }
 0x2d0   : > { %866 = vst.msk [vmem:[%s1334_s22 + $0x8] sm:$0xff] %vm600_vm9, %v1676_v53 }
 0x2d1   : > { %835 = vst.msk [vmem:[%s1334_s22 + $0x18] sm:$0xff] %vm566_vm7, %v1678_v54  ;;  %v871_v40 = vpop.permute.xlu1 %870  ;;  %v841_v50 = vpop.permute.xlu0 %840 }
 0x2d2   : > { %882 = vst.msk [vmem:[%s1334_s22 + $0x8] sm:$0xff] %vm617_vm10, %v871_v40 }
 0x2d3   : > { %851 = vst.msk [vmem:[%s1334_s22 + $0x18] sm:$0xff] %vm583_vm8, %v841_v50 }
 0x2d4   : > { %898 = vst.msk [vmem:[%s1334_s22 + $0x8] sm:$0xff] %vm634_vm11, %v1684_v56 }
 0x2d5   : > { %867 = vst.msk [vmem:[%s1334_s22 + $0x18] sm:$0xff] %vm600_vm9, %v1686_v57  ;;  %v903_v53 = vpop.permute.xlu1 %902  ;;  %v873_v54 = vpop.permute.xlu0 %872 }
 0x2d6   : > { %914 = vst.msk [vmem:[%s1334_s22 + $0x8] sm:$0xff] %vm651_vm12, %v903_v53 }
 0x2d7   : > { %883 = vst.msk [vmem:[%s1334_s22 + $0x18] sm:$0xff] %vm617_vm10, %v873_v54 }
 0x2d8   : > { %930 = vst.msk [vmem:[%s1334_s22 + $0x8] sm:$0xff] %vm668_vm13, %v1692_v32 }
 0x2d9   : > { %899 = vst.msk [vmem:[%s1334_s22 + $0x18] sm:$0xff] %vm634_vm11, %v1694_v59  ;;  %v935_v56 = vpop.permute.xlu1 %934  ;;  %v905_v57 = vpop.permute.xlu0 %904 }
 0x2da   : > { %946 = vst.msk [vmem:[%s1334_s22 + $0x8] sm:$0xff] %vm685_vm14, %v935_v56 }
 0x2db   : > { %915 = vst.msk [vmem:[%s1334_s22 + $0x18] sm:$0xff] %vm651_vm12, %v905_v57 }
 0x2dc   : > { %962 = vst.msk [vmem:[%s1334_s22 + $0x8] sm:$0xff] %vm702_vm15, %v1700_v61 }
 0x2dd   : > { %931 = vst.msk [vmem:[%s1334_s22 + $0x18] sm:$0xff] %vm668_vm13, %v1702_v0  ;;  %v967_v32 = vpop.permute.xlu1 %966  ;;  %v937_v59 = vpop.permute.xlu0 %936 }
 0x2de   : > { %978 = vst.msk [vmem:[%s1334_s22 + $0x8] sm:$0xff] %vm719_vm0, %v967_v32 }
 0x2df   : > { %947 = vst.msk [vmem:[%s1334_s22 + $0x18] sm:$0xff] %vm685_vm14, %v937_v59 }
 0x2e0   : > { %994 = vst.msk [vmem:[%s1334_s22 + $0x8] sm:$0xff] %vm736_vm1, %v1708_v3 }
 0x2e1   : > { %963 = vst.msk [vmem:[%s1334_s22 + $0x18] sm:$0xff] %vm702_vm15, %v1710_v4  ;;  %v987_v61 = vpop.permute.xlu1 %986  ;;  %v969_v37 = vpop.permute.xlu0 %968 }
 0x2e2   : > { %998 = vst.msk [vmem:[%s1334_s22 + $0x8] sm:$0xff] %vm753_vm2, %v1600_v15 }
 0x2e3   : > { %996 = vst.msk [vmem:[%s1334_s22 + $0x28] sm:$0xff] %vm736_vm1, %v987_v61 }
 0x2e4   : > { %979 = vst.msk [vmem:[%s1334_s22 + $0x18] sm:$0xff] %vm719_vm0, %v969_v37 }
 0x2e5   : > { %1000 = vst.msk [vmem:[%s1334_s22 + $0x28] sm:$0xff] %vm753_vm2, %v1474_v38  ;;  %v989_v0 = vpop.permute.xlu0 %988 }
 0x2e6   : > { %995 = vst.msk [vmem:[%s1334_s22 + $0x18] sm:$0xff] %vm736_vm1, %v1716_v14  ;;  %997 = vst.msk [vmem:[%s1334_s22 + $0x38] sm:$0xff] %vm736_vm1, %v989_v0 }
 0x2e7   : > { %999 = vst.msk [vmem:[%s1334_s22 + $0x18] sm:$0xff] %vm753_vm2, %v1610_v20  ;;  %1001 = vst.msk [vmem:[%s1334_s22 + $0x38] sm:$0xff] %vm753_vm2, %v1482_v41 }
 0x2e8 PF: > { %s13_s12 = sadd.s32 1, %s1196_s12  }
 0x2e9   : > { %p10_p4 = scmp.ge.s32.totalorder %s13_s12, 4  }
 0x2eb   :  { %12 = sbr.rel (!%p10_p4) target bundleno = 1 (0x1), region = 62 }

</bundles_post_ra>
